<compile_context>
chip_gen: v5e
topology: v5e:2x2
jax: 0.10.0
libtpu: 0.0.40
codegen_flags: <defaults>
</compile_context>

<pallas_src>
import math
import functools

import jax
import jax.numpy as jnp
from jax.experimental import pallas as pl
from jax.experimental.pallas import tpu as pltpu

HIDDEN = 16      # self.hidden
HEADS = 16       # self.heads  -> d_k = HIDDEN // HEADS = 1
N_LAYERS = 2     # self.n_layers
FF = HIDDEN * 4  # feed_forward_hidden
EPS = 1e-6       # LayerNorm eps

# --- per-layer parameter slab layout: (SLAB_ROWS, SLAB_LANES) f32 -----------
_R_WQKV = 0            # rows   0:16 , lanes 0:48  -> concat(wq|wk|wv)
_R_WO = 16             # rows  16:32 , lanes 0:16
_R_WF1 = 32            # rows  32:48 , lanes 0:64
_R_WF2 = 48            # rows  48:112, lanes 0:16
_R_BQKV = 112          # row 112, lanes 0:48
_R_BO = 113            # row 113, lanes 0:16
_R_BF1 = 114           # row 114, lanes 0:64
_R_BF2 = 115           # row 115, lanes 0:16
_R_LN1W = 116
_R_LN1B = 117
_R_LN2W = 118
_R_LN2B = 119
SLAB_ROWS = 120
SLAB_LANES = 64


# ----------------------------- kernel helpers -------------------------------

def _layer_norm(x, w, b):
    # torch custom LayerNorm: mean over last dim; std is the *unbiased* (N-1)
    # std; y = w * (x - mean) / (std + eps) + b
    d = x.shape[-1]
    mean = jnp.mean(x, axis=-1, keepdims=True)
    diff = x - mean
    var = jnp.sum(diff * diff, axis=-1, keepdims=True) * (1.0 / (d - 1))
    inv = pl.reciprocal(jnp.sqrt(var) + EPS, approx=True)
    return w * diff * inv + b


def _gelu(x):
    c = math.sqrt(2.0 / math.pi)
    return 0.5 * x * (1.0 + jnp.tanh(c * (x + 0.044715 * x * x * x)))


# --------------------------------- kernel -----------------------------------

def transformer_kernel(seq_ref, w0_ref, pe_ref, slab_ref, wh_ref, bh_ref,
                       xres_ref, xout_ref, *, batch, seq_len):
    # Embedding: linear0 + (bias + positional embedding); dropout = identity.
    x = jnp.dot(seq_ref[...], w0_ref[...],
                preferred_element_type=jnp.float32) + pe_ref[...]   # (B*L, H)

    for l in range(N_LAYERS):                       # static unroll (2 layers)
        wqkv = slab_ref[l, _R_WQKV:_R_WQKV + HIDDEN, 0:3 * HIDDEN]   # (16, 48)
        wo = slab_ref[l, _R_WO:_R_WO + HIDDEN, 0:HIDDEN]             # (16, 16)
        wf1 = slab_ref[l, _R_WF1:_R_WF1 + HIDDEN, 0:FF]              # (16, 64)
        wf2 = slab_ref[l, _R_WF2:_R_WF2 + FF, 0:HIDDEN]              # (64, 16)
        bqkv = slab_ref[l, _R_BQKV:_R_BQKV + 1, 0:3 * HIDDEN]        # (1, 48)
        bo = slab_ref[l, _R_BO:_R_BO + 1, 0:HIDDEN]
        bf1 = slab_ref[l, _R_BF1:_R_BF1 + 1, 0:FF]
        bf2 = slab_ref[l, _R_BF2:_R_BF2 + 1, 0:HIDDEN]
        ln1w = slab_ref[l, _R_LN1W:_R_LN1W + 1, 0:HIDDEN]
        ln1b = slab_ref[l, _R_LN1B:_R_LN1B + 1, 0:HIDDEN]
        ln2w = slab_ref[l, _R_LN2W:_R_LN2W + 1, 0:HIDDEN]
        ln2b = slab_ref[l, _R_LN2B:_R_LN2B + 1, 0:HIDDEN]

        # ---- fused QKV projection (one MXU push instead of three) ----
        qkv = jnp.dot(x, wqkv, preferred_element_type=jnp.float32) + bqkv
        q = qkv[:, 0:HIDDEN]
        k = qkv[:, HIDDEN:2 * HIDDEN]
        v = qkv[:, 2 * HIDDEN:3 * HIDDEN]

        # ---- multi-headed self-attention, heads kept on the lane axis ----
        # HEADS == HIDDEN -> d_k == 1, so 1/sqrt(d_k) == 1 and per-head scores
        # are elementwise products; softmax reduces over the sublane (key) axis.
        attn_rows = []
        for b in range(batch):                       # static unroll over batch
            r0 = b * seq_len
            qb = q[r0:r0 + seq_len, :]               # (L, H)
            kb = k[r0:r0 + seq_len, :]
            vb = v[r0:r0 + seq_len, :]
            s = qb[:, None, :] * kb[None, :, :]      # (Lq, Lk, H)
            m = jnp.max(s, axis=1, keepdims=True)
            e = jnp.exp(s - m)
            p = e * pl.reciprocal(jnp.sum(e, axis=1, keepdims=True), approx=True)
            attn_rows.append(jnp.sum(p * vb[None, :, :], axis=1))   # (Lq, H)
        attn = jnp.concatenate(attn_rows, axis=0) if batch > 1 else attn_rows[0]
        attn = jnp.dot(attn, wo, preferred_element_type=jnp.float32) + bo

        # SublayerConnection #1: LN(x + attention(x)); dropout = identity
        x = _layer_norm(x + attn, ln1w, ln1b)

        # ---- position-wise feed forward ----
        h = _gelu(jnp.dot(x, wf1, preferred_element_type=jnp.float32) + bf1)
        ff = jnp.dot(h, wf2, preferred_element_type=jnp.float32) + bf2

        # SublayerConnection #2: LN(x + ff(x)); trailing block dropout = identity
        x = _layer_norm(x + ff, ln2w, ln2b)

    xout_ref[...] = x
    # Fused output head: (x @ w1 + b1) @ w2 + b2 == x @ (w1@w2) + (b1@w2 + b2)
    xres_ref[...] = jnp.dot(x, wh_ref[...],
                            preferred_element_type=jnp.float32) + bh_ref[...]


# ---------------------- host-side parameter packing --------------------------
# Done ONCE (outside the jitted forward): pure repacking / algebraic folding.

def _pack_layer_slab(params):
    slabs = []
    for l in range(N_LAYERS):
        slab = jnp.zeros((SLAB_ROWS, SLAB_LANES), jnp.float32)
        wqkv = jnp.concatenate(
            [params["wq"][l], params["wk"][l], params["wv"][l]], axis=1)
        bqkv = jnp.concatenate(
            [params["bq"][l], params["bk"][l], params["bv"][l]], axis=0)
        slab = slab.at[_R_WQKV:_R_WQKV + HIDDEN, 0:3 * HIDDEN].set(wqkv)
        slab = slab.at[_R_WO:_R_WO + HIDDEN, 0:HIDDEN].set(params["wo"][l])
        slab = slab.at[_R_WF1:_R_WF1 + HIDDEN, 0:FF].set(params["wf1"][l])
        slab = slab.at[_R_WF2:_R_WF2 + FF, 0:HIDDEN].set(params["wf2"][l])
        slab = slab.at[_R_BQKV, 0:3 * HIDDEN].set(bqkv)
        slab = slab.at[_R_BO, 0:HIDDEN].set(params["bo"][l])
        slab = slab.at[_R_BF1, 0:FF].set(params["bf1"][l])
        slab = slab.at[_R_BF2, 0:HIDDEN].set(params["bf2"][l])
        slab = slab.at[_R_LN1W, 0:HIDDEN].set(params["ln1w"][l])
        slab = slab.at[_R_LN1B, 0:HIDDEN].set(params["ln1b"][l])
        slab = slab.at[_R_LN2W, 0:HIDDEN].set(params["ln2w"][l])
        slab = slab.at[_R_LN2B, 0:HIDDEN].set(params["ln2b"][l])
        slabs.append(slab)
    return jnp.stack(slabs, axis=0)          # (N_LAYERS, 120, 64)


def pack_params(params, batch):
    """One-time preprocessing: slab packing, head fusion, pe+bias tiling."""
    pe_b0 = jnp.tile(params["pe"] + params["b0"], (batch, 1))      # (B*L, H)
    slab = _pack_layer_slab(params)
    w_head = params["w1"] @ params["w2"]                           # (H, out)
    b_head = params["b1"] @ params["w2"] + params["b2"]            # (1, out)
    return dict(w0=params["w0"], pe_b0=pe_b0, slab=slab,
                w_head=w_head, b_head=b_head)


# --------------------------------- wrapper ----------------------------------

def transformer_forward(seq, packed):
    B, L, M = seq.shape
    out_sz = packed["w_head"].shape[1]
    R = B * L

    seq2d = seq.reshape(R, M)
    inputs = (seq2d, packed["w0"], packed["pe_b0"], packed["slab"],
              packed["w_head"], packed["b_head"])

    def full_spec(a):
        nd = a.ndim
        return pl.BlockSpec(a.shape, lambda i, _nd=nd: (0,) * _nd)

    kernel = functools.partial(transformer_kernel, batch=B, seq_len=L)
    x_res2d, x2d = pl.pallas_call(
        kernel,
        grid=(1,),
        in_specs=[full_spec(a) for a in inputs],
        out_specs=[
            pl.BlockSpec((R, out_sz), lambda i: (0, 0)),
            pl.BlockSpec((R, HIDDEN), lambda i: (0, 0)),
        ],
        out_shape=(
            jax.ShapeDtypeStruct((R, out_sz), jnp.float32),
            jax.ShapeDtypeStruct((R, HIDDEN), jnp.float32),
        ),
        compiler_params=pltpu.CompilerParams(
            dimension_semantics=("arbitrary",)),
    )(*inputs)
    return x_res2d.reshape(B, L, out_sz), x2d.reshape(B, L, HIDDEN)


# --------------------------- parameter creation ------------------------------

def init_params(key, m, window_size, output_size):
    """Deterministic init: truncated normal N(0, 0.02) clipped to +-2 sigma
    (matching truncated_normal_init); LayerNorm params stay ones/zeros."""
    keys = iter(jax.random.split(key, 32))

    def tn(shape):
        return jax.random.truncated_normal(next(keys), -2.0, 2.0, shape,
                                           jnp.float32) * 0.02

    return dict(
        w0=tn((m, HIDDEN)), b0=tn((1, HIDDEN)), pe=tn((window_size, HIDDEN)),
        wq=tn((N_LAYERS, HIDDEN, HIDDEN)), bq=tn((N_LAYERS, HIDDEN)),
        wk=tn((N_LAYERS, HIDDEN, HIDDEN)), bk=tn((N_LAYERS, HIDDEN)),
        wv=tn((N_LAYERS, HIDDEN, HIDDEN)), bv=tn((N_LAYERS, HIDDEN)),
        wo=tn((N_LAYERS, HIDDEN, HIDDEN)), bo=tn((N_LAYERS, HIDDEN)),
        ln1w=jnp.ones((N_LAYERS, HIDDEN), jnp.float32),
        ln1b=jnp.zeros((N_LAYERS, HIDDEN), jnp.float32),
        ln2w=jnp.ones((N_LAYERS, HIDDEN), jnp.float32),
        ln2b=jnp.zeros((N_LAYERS, HIDDEN), jnp.float32),
        wf1=tn((N_LAYERS, HIDDEN, FF)), bf1=tn((N_LAYERS, FF)),
        wf2=tn((N_LAYERS, FF, HIDDEN)), bf2=tn((N_LAYERS, HIDDEN)),
        w1=tn((HIDDEN, 128)), b1=tn((1, 128)),
        w2=tn((128, output_size)), b2=tn((1, output_size)),
    )


# ----------------------------- pure-JAX reference ----------------------------

def reference_forward(seq, params):
    def ln(x, w, b):
        d = x.shape[-1]
        mean = jnp.mean(x, axis=-1, keepdims=True)
        std = jnp.sqrt(jnp.sum((x - mean) ** 2, axis=-1, keepdims=True) / (d - 1))
        return w * (x - mean) / (std + EPS) + b

    def gelu(x):
        return 0.5 * x * (1.0 + jnp.tanh(math.sqrt(2.0 / math.pi)
                                         * (x + 0.044715 * x ** 3)))

    B, L, _ = seq.shape
    d_k = HIDDEN // HEADS
    x = seq @ params["w0"] + params["b0"] + params["pe"][None]
    for l in range(N_LAYERS):
        q = x @ params["wq"][l] + params["bq"][l]
        k = x @ params["wk"][l] + params["bk"][l]
        v = x @ params["wv"][l] + params["bv"][l]
        q = q.reshape(B, L, HEADS, d_k).transpose(0, 2, 1, 3)
        k = k.reshape(B, L, HEADS, d_k).transpose(0, 2, 1, 3)
        v = v.reshape(B, L, HEADS, d_k).transpose(0, 2, 1, 3)
        scores = jnp.einsum("bhid,bhjd->bhij", q, k) / math.sqrt(d_k)
        p = jax.nn.softmax(scores, axis=-1)
        a = jnp.einsum("bhij,bhjd->bhid", p, v).transpose(0, 2, 1, 3)
        a = a.reshape(B, L, HIDDEN)
        a = a @ params["wo"][l] + params["bo"][l]
        x = ln(x + a, params["ln1w"][l], params["ln1b"][l])
        h = gelu(x @ params["wf1"][l] + params["bf1"][l])
        ff = h @ params["wf2"][l] + params["bf2"][l]
        x = ln(x + ff, params["ln2w"][l], params["ln2b"][l])
    x_res = (x @ params["w1"] + params["b1"]) @ params["w2"] + params["b2"]
    return x_res, x


# ---------------------------------- main -------------------------------------

if __name__ == "__main__":
    # args: window_size=8, m=4, output_size=4, drop_out (identity at inference)
    B, L, M, OUT = 2, 8, 4, 4

    key = jax.random.PRNGKey(0)
    k_param, k_seq = jax.random.split(key)
    params = init_params(k_param, M, L, OUT)
    seq = jax.random.normal(k_seq, (B, L, M), jnp.float32)

    # One-time parameter packing outside the hot path.
    packed = jax.tree_util.tree_map(jax.block_until_ready, pack_params(params, B))

    fwd = jax.jit(transformer_forward)
    x_res, x = fwd(seq, packed)
    jax.block_until_ready((x_res, x))

    r_res, r_x = reference_forward(seq, params)
    assert x_res.shape == (B, L, OUT) and x.shape == (B, L, HIDDEN)
    # 2e-3 tolerance: approximate EUP reciprocal (softmax/LN) and the fused
    # w1@w2 output head change fp32 rounding at the ~1e-4 level.
    assert jnp.allclose(x_res, r_res, atol=2e-3, rtol=2e-3)
    assert jnp.allclose(x, r_x, atol=2e-3, rtol=2e-3)

    print("KERNEL_OK")
</pallas_src>

<mosaic_0001>
module attributes {stable_mosaic.version = 11 : i64} {
  func.func @transformer_kernel(%arg0: i32, %arg1: memref<16x4xf32, #tpu.memory_space<vmem>>, %arg2: memref<4x16xf32, #tpu.memory_space<vmem>>, %arg3: memref<16x16xf32, #tpu.memory_space<vmem>>, %arg4: memref<2x120x64xf32, #tpu.memory_space<vmem>>, %arg5: memref<16x4xf32, #tpu.memory_space<vmem>>, %arg6: memref<1x4xf32, #tpu.memory_space<vmem>>, %arg7: memref<16x4xf32, #tpu.memory_space<vmem>>, %arg8: memref<16x16xf32, #tpu.memory_space<vmem>>) attributes {dimension_semantics = [#tpu.dimension_semantics<arbitrary>], iteration_bounds = array<i64: 1>, scalar_prefetch = 0 : i64, scratch_operands = 0 : i64, tpu.core_type = #tpu.core_type<tc>, window_params = [{pipeline_mode = #tpu.pipeline_mode<synchronous>, transform_indices = @transform_0, window_bounds = array<i64: 16, 4>}, {pipeline_mode = #tpu.pipeline_mode<synchronous>, transform_indices = @transform_1, window_bounds = array<i64: 4, 16>}, {pipeline_mode = #tpu.pipeline_mode<synchronous>, transform_indices = @transform_2, window_bounds = array<i64: 16, 16>}, {pipeline_mode = #tpu.pipeline_mode<synchronous>, transform_indices = @transform_3, window_bounds = array<i64: 2, 120, 64>}, {pipeline_mode = #tpu.pipeline_mode<synchronous>, transform_indices = @transform_4, window_bounds = array<i64: 16, 4>}, {pipeline_mode = #tpu.pipeline_mode<synchronous>, transform_indices = @transform_5, window_bounds = array<i64: 1, 4>}, {pipeline_mode = #tpu.pipeline_mode<synchronous>, transform_indices = @transform_6, window_bounds = array<i64: 16, 4>}, {pipeline_mode = #tpu.pipeline_mode<synchronous>, transform_indices = @transform_7, window_bounds = array<i64: 16, 16>}]} {
    %c0 = arith.constant 0 : index
    %c0_0 = arith.constant 0 : index
    %0 = vector.load %arg1[%c0, %c0_0] : memref<16x4xf32, #tpu.memory_space<vmem>>, vector<16x4xf32>
    %c0_1 = arith.constant 0 : index
    %c0_2 = arith.constant 0 : index
    %1 = vector.load %arg2[%c0_1, %c0_2] : memref<4x16xf32, #tpu.memory_space<vmem>>, vector<4x16xf32>
    %cst = arith.constant dense<0.000000e+00> : vector<16x16xf32>
    %2 = tpu.matmul %0, %1, %cst {dimension_numbers = #tpu.dot_dimension_numbers<[1], [0], [0], [1], [0, 0, 1, 1], [], []>} : vector<16x4xf32>, vector<4x16xf32>, vector<16x16xf32> -> vector<16x16xf32>
    %c0_3 = arith.constant 0 : index
    %c0_4 = arith.constant 0 : index
    %3 = vector.load %arg3[%c0_3, %c0_4] : memref<16x16xf32, #tpu.memory_space<vmem>>, vector<16x16xf32>
    %4 = arith.addf %2, %3 : vector<16x16xf32>
    %c0_5 = arith.constant 0 : index
    %c0_6 = arith.constant 0 : index
    %c0_7 = arith.constant 0 : index
    %5 = vector.load %arg4[%c0_5, %c0_6, %c0_7] : memref<2x120x64xf32, #tpu.memory_space<vmem>>, vector<1x16x48xf32>
    %6 = vector.shape_cast %5 : vector<1x16x48xf32> to vector<16x48xf32>
    %c0_8 = arith.constant 0 : index
    %c16 = arith.constant 16 : index
    %c0_9 = arith.constant 0 : index
    %7 = vector.load %arg4[%c0_8, %c16, %c0_9] : memref<2x120x64xf32, #tpu.memory_space<vmem>>, vector<1x16x16xf32>
    %8 = vector.shape_cast %7 : vector<1x16x16xf32> to vector<16x16xf32>
    %c0_10 = arith.constant 0 : index
    %c32 = arith.constant 32 : index
    %c0_11 = arith.constant 0 : index
    %9 = vector.load %arg4[%c0_10, %c32, %c0_11] : memref<2x120x64xf32, #tpu.memory_space<vmem>>, vector<1x16x64xf32>
    %10 = vector.shape_cast %9 : vector<1x16x64xf32> to vector<16x64xf32>
    %c0_12 = arith.constant 0 : index
    %c48 = arith.constant 48 : index
    %c0_13 = arith.constant 0 : index
    %11 = vector.load %arg4[%c0_12, %c48, %c0_13] : memref<2x120x64xf32, #tpu.memory_space<vmem>>, vector<1x64x16xf32>
    %12 = vector.shape_cast %11 : vector<1x64x16xf32> to vector<64x16xf32>
    %c0_14 = arith.constant 0 : index
    %c112 = arith.constant 112 : index
    %c0_15 = arith.constant 0 : index
    %13 = vector.load %arg4[%c0_14, %c112, %c0_15] : memref<2x120x64xf32, #tpu.memory_space<vmem>>, vector<1x1x48xf32>
    %14 = vector.shape_cast %13 : vector<1x1x48xf32> to vector<1x48xf32>
    %c0_16 = arith.constant 0 : index
    %c113 = arith.constant 113 : index
    %c0_17 = arith.constant 0 : index
    %15 = vector.load %arg4[%c0_16, %c113, %c0_17] : memref<2x120x64xf32, #tpu.memory_space<vmem>>, vector<1x1x16xf32>
    %16 = vector.shape_cast %15 : vector<1x1x16xf32> to vector<1x16xf32>
    %c0_18 = arith.constant 0 : index
    %c114 = arith.constant 114 : index
    %c0_19 = arith.constant 0 : index
    %17 = vector.load %arg4[%c0_18, %c114, %c0_19] : memref<2x120x64xf32, #tpu.memory_space<vmem>>, vector<1x1x64xf32>
    %18 = vector.shape_cast %17 : vector<1x1x64xf32> to vector<1x64xf32>
    %c0_20 = arith.constant 0 : index
    %c115 = arith.constant 115 : index
    %c0_21 = arith.constant 0 : index
    %19 = vector.load %arg4[%c0_20, %c115, %c0_21] : memref<2x120x64xf32, #tpu.memory_space<vmem>>, vector<1x1x16xf32>
    %20 = vector.shape_cast %19 : vector<1x1x16xf32> to vector<1x16xf32>
    %c0_22 = arith.constant 0 : index
    %c116 = arith.constant 116 : index
    %c0_23 = arith.constant 0 : index
    %21 = vector.load %arg4[%c0_22, %c116, %c0_23] : memref<2x120x64xf32, #tpu.memory_space<vmem>>, vector<1x1x16xf32>
    %22 = vector.shape_cast %21 : vector<1x1x16xf32> to vector<1x16xf32>
    %c0_24 = arith.constant 0 : index
    %c117 = arith.constant 117 : index
    %c0_25 = arith.constant 0 : index
    %23 = vector.load %arg4[%c0_24, %c117, %c0_25] : memref<2x120x64xf32, #tpu.memory_space<vmem>>, vector<1x1x16xf32>
    %24 = vector.shape_cast %23 : vector<1x1x16xf32> to vector<1x16xf32>
    %c0_26 = arith.constant 0 : index
    %c118 = arith.constant 118 : index
    %c0_27 = arith.constant 0 : index
    %25 = vector.load %arg4[%c0_26, %c118, %c0_27] : memref<2x120x64xf32, #tpu.memory_space<vmem>>, vector<1x1x16xf32>
    %26 = vector.shape_cast %25 : vector<1x1x16xf32> to vector<1x16xf32>
    %c0_28 = arith.constant 0 : index
    %c119 = arith.constant 119 : index
    %c0_29 = arith.constant 0 : index
    %27 = vector.load %arg4[%c0_28, %c119, %c0_29] : memref<2x120x64xf32, #tpu.memory_space<vmem>>, vector<1x1x16xf32>
    %28 = vector.shape_cast %27 : vector<1x1x16xf32> to vector<1x16xf32>
    %cst_30 = arith.constant dense<0.000000e+00> : vector<16x48xf32>
    %29 = tpu.matmul %4, %6, %cst_30 {dimension_numbers = #tpu.dot_dimension_numbers<[1], [0], [0], [1], [0, 0, 1, 1], [], []>} : vector<16x16xf32>, vector<16x48xf32>, vector<16x48xf32> -> vector<16x48xf32>
    %30 = vector.broadcast %14 : vector<1x48xf32> to vector<16x48xf32>
    %31 = arith.addf %29, %30 : vector<16x48xf32>
    %32 = vector.extract_strided_slice %31 {offsets = [0, 0], sizes = [16, 16], strides = [1, 1]} : vector<16x48xf32> to vector<16x16xf32>
    %33 = vector.extract_strided_slice %31 {offsets = [0, 16], sizes = [16, 16], strides = [1, 1]} : vector<16x48xf32> to vector<16x16xf32>
    %34 = vector.extract_strided_slice %31 {offsets = [0, 32], sizes = [16, 16], strides = [1, 1]} : vector<16x48xf32> to vector<16x16xf32>
    %35 = vector.extract_strided_slice %32 {offsets = [0, 0], sizes = [8, 16], strides = [1, 1]} : vector<16x16xf32> to vector<8x16xf32>
    %36 = vector.extract_strided_slice %33 {offsets = [0, 0], sizes = [8, 16], strides = [1, 1]} : vector<16x16xf32> to vector<8x16xf32>
    %37 = vector.extract_strided_slice %34 {offsets = [0, 0], sizes = [8, 16], strides = [1, 1]} : vector<16x16xf32> to vector<8x16xf32>
    %38 = vector.shape_cast %35 : vector<8x16xf32> to vector<8x1x16xf32>
    %39 = vector.shape_cast %36 : vector<8x16xf32> to vector<1x8x16xf32>
    %40 = vector.broadcast %38 : vector<8x1x16xf32> to vector<8x8x16xf32>
    %41 = vector.broadcast %39 : vector<1x8x16xf32> to vector<8x8x16xf32>
    %42 = arith.mulf %40, %41 : vector<8x8x16xf32>
    %cst_31 = arith.constant dense<0xFF800000> : vector<8x16xf32>
    %43 = vector.multi_reduction <maximumf>, %42, %cst_31 [1] : vector<8x8x16xf32> to vector<8x16xf32>
    %44 = vector.shape_cast %43 : vector<8x16xf32> to vector<8x1x16xf32>
    %45 = vector.broadcast %44 : vector<8x1x16xf32> to vector<8x8x16xf32>
    %46 = arith.subf %42, %45 : vector<8x8x16xf32>
    %47 = math.exp %46 : vector<8x8x16xf32>
    %cst_32 = arith.constant dense<0.000000e+00> : vector<8x16xf32>
    %48 = vector.multi_reduction <add>, %47, %cst_32 [1] : vector<8x8x16xf32> to vector<8x16xf32>
    %49 = vector.shape_cast %48 : vector<8x16xf32> to vector<8x1x16xf32>
    %50 = tpu.reciprocal %49 {approx = true} : vector<8x1x16xf32> -> vector<8x1x16xf32>
    %51 = vector.broadcast %50 : vector<8x1x16xf32> to vector<8x8x16xf32>
    %52 = arith.mulf %47, %51 : vector<8x8x16xf32>
    %53 = vector.shape_cast %37 : vector<8x16xf32> to vector<1x8x16xf32>
    %54 = vector.broadcast %53 : vector<1x8x16xf32> to vector<8x8x16xf32>
    %55 = arith.mulf %52, %54 : vector<8x8x16xf32>
    %cst_33 = arith.constant dense<0.000000e+00> : vector<8x16xf32>
    %56 = vector.multi_reduction <add>, %55, %cst_33 [1] : vector<8x8x16xf32> to vector<8x16xf32>
    %57 = vector.extract_strided_slice %32 {offsets = [8, 0], sizes = [8, 16], strides = [1, 1]} : vector<16x16xf32> to vector<8x16xf32>
    %58 = vector.extract_strided_slice %33 {offsets = [8, 0], sizes = [8, 16], strides = [1, 1]} : vector<16x16xf32> to vector<8x16xf32>
    %59 = vector.extract_strided_slice %34 {offsets = [8, 0], sizes = [8, 16], strides = [1, 1]} : vector<16x16xf32> to vector<8x16xf32>
    %60 = vector.shape_cast %57 : vector<8x16xf32> to vector<8x1x16xf32>
    %61 = vector.shape_cast %58 : vector<8x16xf32> to vector<1x8x16xf32>
    %62 = vector.broadcast %60 : vector<8x1x16xf32> to vector<8x8x16xf32>
    %63 = vector.broadcast %61 : vector<1x8x16xf32> to vector<8x8x16xf32>
    %64 = arith.mulf %62, %63 : vector<8x8x16xf32>
    %cst_34 = arith.constant dense<0xFF800000> : vector<8x16xf32>
    %65 = vector.multi_reduction <maximumf>, %64, %cst_34 [1] : vector<8x8x16xf32> to vector<8x16xf32>
    %66 = vector.shape_cast %65 : vector<8x16xf32> to vector<8x1x16xf32>
    %67 = vector.broadcast %66 : vector<8x1x16xf32> to vector<8x8x16xf32>
    %68 = arith.subf %64, %67 : vector<8x8x16xf32>
    %69 = math.exp %68 : vector<8x8x16xf32>
    %cst_35 = arith.constant dense<0.000000e+00> : vector<8x16xf32>
    %70 = vector.multi_reduction <add>, %69, %cst_35 [1] : vector<8x8x16xf32> to vector<8x16xf32>
    %71 = vector.shape_cast %70 : vector<8x16xf32> to vector<8x1x16xf32>
    %72 = tpu.reciprocal %71 {approx = true} : vector<8x1x16xf32> -> vector<8x1x16xf32>
    %73 = vector.broadcast %72 : vector<8x1x16xf32> to vector<8x8x16xf32>
    %74 = arith.mulf %69, %73 : vector<8x8x16xf32>
    %75 = vector.shape_cast %59 : vector<8x16xf32> to vector<1x8x16xf32>
    %76 = vector.broadcast %75 : vector<1x8x16xf32> to vector<8x8x16xf32>
    %77 = arith.mulf %74, %76 : vector<8x8x16xf32>
    %cst_36 = arith.constant dense<0.000000e+00> : vector<8x16xf32>
    %78 = vector.multi_reduction <add>, %77, %cst_36 [1] : vector<8x8x16xf32> to vector<8x16xf32>
    %79 = tpu.concatenate %56, %78 in 0 : vector<8x16xf32>, vector<8x16xf32> -> vector<16x16xf32>
    %cst_37 = arith.constant dense<0.000000e+00> : vector<16x16xf32>
    %80 = tpu.matmul %79, %8, %cst_37 {dimension_numbers = #tpu.dot_dimension_numbers<[1], [0], [0], [1], [0, 0, 1, 1], [], []>} : vector<16x16xf32>, vector<16x16xf32>, vector<16x16xf32> -> vector<16x16xf32>
    %81 = vector.broadcast %16 : vector<1x16xf32> to vector<16x16xf32>
    %82 = arith.addf %80, %81 : vector<16x16xf32>
    %83 = arith.addf %4, %82 : vector<16x16xf32>
    %cst_38 = arith.constant dense<0.000000e+00> : vector<16xf32>
    %84 = vector.multi_reduction <add>, %83, %cst_38 [1] : vector<16x16xf32> to vector<16xf32>
    %85 = vector.shape_cast %84 : vector<16xf32> to vector<16x1xf32>
    %cst_39 = arith.constant 1.600000e+01 : f32
    %86 = vector.broadcast %cst_39 : f32 to vector<16x1xf32>
    %87 = arith.divf %85, %86 : vector<16x1xf32>
    %88 = vector.broadcast %87 : vector<16x1xf32> to vector<16x16xf32>
    %89 = arith.subf %83, %88 : vector<16x16xf32>
    %90 = arith.mulf %89, %89 : vector<16x16xf32>
    %cst_40 = arith.constant dense<0.000000e+00> : vector<16xf32>
    %91 = vector.multi_reduction <add>, %90, %cst_40 [1] : vector<16x16xf32> to vector<16xf32>
    %92 = vector.shape_cast %91 : vector<16xf32> to vector<16x1xf32>
    %cst_41 = arith.constant 0.0666666701 : f32
    %93 = vector.broadcast %cst_41 : f32 to vector<16x1xf32>
    %94 = arith.mulf %92, %93 : vector<16x1xf32>
    %95 = math.sqrt %94 : vector<16x1xf32>
    %cst_42 = arith.constant 9.99999997E-7 : f32
    %96 = vector.broadcast %cst_42 : f32 to vector<16x1xf32>
    %97 = arith.addf %95, %96 : vector<16x1xf32>
    %98 = tpu.reciprocal %97 {approx = true} : vector<16x1xf32> -> vector<16x1xf32>
    %99 = vector.broadcast %22 : vector<1x16xf32> to vector<16x16xf32>
    %100 = arith.mulf %99, %89 : vector<16x16xf32>
    %101 = vector.broadcast %98 : vector<16x1xf32> to vector<16x16xf32>
    %102 = arith.mulf %100, %101 : vector<16x16xf32>
    %103 = vector.broadcast %24 : vector<1x16xf32> to vector<16x16xf32>
    %104 = arith.addf %102, %103 : vector<16x16xf32>
    %cst_43 = arith.constant dense<0.000000e+00> : vector<16x64xf32>
    %105 = tpu.matmul %104, %10, %cst_43 {dimension_numbers = #tpu.dot_dimension_numbers<[1], [0], [0], [1], [0, 0, 1, 1], [], []>} : vector<16x16xf32>, vector<16x64xf32>, vector<16x64xf32> -> vector<16x64xf32>
    %106 = vector.broadcast %18 : vector<1x64xf32> to vector<16x64xf32>
    %107 = arith.addf %105, %106 : vector<16x64xf32>
    %cst_44 = arith.constant 5.000000e-01 : f32
    %108 = vector.broadcast %cst_44 : f32 to vector<16x64xf32>
    %109 = arith.mulf %108, %107 : vector<16x64xf32>
    %cst_45 = arith.constant 4.471500e-02 : f32
    %110 = vector.broadcast %cst_45 : f32 to vector<16x64xf32>
    %111 = arith.mulf %110, %107 : vector<16x64xf32>
    %112 = arith.mulf %111, %107 : vector<16x64xf32>
    %113 = arith.mulf %112, %107 : vector<16x64xf32>
    %114 = arith.addf %107, %113 : vector<16x64xf32>
    %cst_46 = arith.constant 0.797884583 : f32
    %115 = vector.broadcast %cst_46 : f32 to vector<16x64xf32>
    %116 = arith.mulf %115, %114 : vector<16x64xf32>
    %117 = math.tanh %116 : vector<16x64xf32>
    %cst_47 = arith.constant 1.000000e+00 : f32
    %118 = vector.broadcast %cst_47 : f32 to vector<16x64xf32>
    %119 = arith.addf %118, %117 : vector<16x64xf32>
    %120 = arith.mulf %109, %119 : vector<16x64xf32>
    %cst_48 = arith.constant dense<0.000000e+00> : vector<16x16xf32>
    %121 = tpu.matmul %120, %12, %cst_48 {dimension_numbers = #tpu.dot_dimension_numbers<[1], [0], [0], [1], [0, 0, 1, 1], [], []>} : vector<16x64xf32>, vector<64x16xf32>, vector<16x16xf32> -> vector<16x16xf32>
    %122 = vector.broadcast %20 : vector<1x16xf32> to vector<16x16xf32>
    %123 = arith.addf %121, %122 : vector<16x16xf32>
    %124 = arith.addf %104, %123 : vector<16x16xf32>
    %cst_49 = arith.constant dense<0.000000e+00> : vector<16xf32>
    %125 = vector.multi_reduction <add>, %124, %cst_49 [1] : vector<16x16xf32> to vector<16xf32>
    %126 = vector.shape_cast %125 : vector<16xf32> to vector<16x1xf32>
    %cst_50 = arith.constant 1.600000e+01 : f32
    %127 = vector.broadcast %cst_50 : f32 to vector<16x1xf32>
    %128 = arith.divf %126, %127 : vector<16x1xf32>
    %129 = vector.broadcast %128 : vector<16x1xf32> to vector<16x16xf32>
    %130 = arith.subf %124, %129 : vector<16x16xf32>
    %131 = arith.mulf %130, %130 : vector<16x16xf32>
    %cst_51 = arith.constant dense<0.000000e+00> : vector<16xf32>
    %132 = vector.multi_reduction <add>, %131, %cst_51 [1] : vector<16x16xf32> to vector<16xf32>
    %133 = vector.shape_cast %132 : vector<16xf32> to vector<16x1xf32>
    %cst_52 = arith.constant 0.0666666701 : f32
    %134 = vector.broadcast %cst_52 : f32 to vector<16x1xf32>
    %135 = arith.mulf %133, %134 : vector<16x1xf32>
    %136 = math.sqrt %135 : vector<16x1xf32>
    %cst_53 = arith.constant 9.99999997E-7 : f32
    %137 = vector.broadcast %cst_53 : f32 to vector<16x1xf32>
    %138 = arith.addf %136, %137 : vector<16x1xf32>
    %139 = tpu.reciprocal %138 {approx = true} : vector<16x1xf32> -> vector<16x1xf32>
    %140 = vector.broadcast %26 : vector<1x16xf32> to vector<16x16xf32>
    %141 = arith.mulf %140, %130 : vector<16x16xf32>
    %142 = vector.broadcast %139 : vector<16x1xf32> to vector<16x16xf32>
    %143 = arith.mulf %141, %142 : vector<16x16xf32>
    %144 = vector.broadcast %28 : vector<1x16xf32> to vector<16x16xf32>
    %145 = arith.addf %143, %144 : vector<16x16xf32>
    %c1 = arith.constant 1 : index
    %c0_54 = arith.constant 0 : index
    %c0_55 = arith.constant 0 : index
    %146 = vector.load %arg4[%c1, %c0_54, %c0_55] : memref<2x120x64xf32, #tpu.memory_space<vmem>>, vector<1x16x48xf32>
    %147 = vector.shape_cast %146 : vector<1x16x48xf32> to vector<16x48xf32>
    %c1_56 = arith.constant 1 : index
    %c16_57 = arith.constant 16 : index
    %c0_58 = arith.constant 0 : index
    %148 = vector.load %arg4[%c1_56, %c16_57, %c0_58] : memref<2x120x64xf32, #tpu.memory_space<vmem>>, vector<1x16x16xf32>
    %149 = vector.shape_cast %148 : vector<1x16x16xf32> to vector<16x16xf32>
    %c1_59 = arith.constant 1 : index
    %c32_60 = arith.constant 32 : index
    %c0_61 = arith.constant 0 : index
    %150 = vector.load %arg4[%c1_59, %c32_60, %c0_61] : memref<2x120x64xf32, #tpu.memory_space<vmem>>, vector<1x16x64xf32>
    %151 = vector.shape_cast %150 : vector<1x16x64xf32> to vector<16x64xf32>
    %c1_62 = arith.constant 1 : index
    %c48_63 = arith.constant 48 : index
    %c0_64 = arith.constant 0 : index
    %152 = vector.load %arg4[%c1_62, %c48_63, %c0_64] : memref<2x120x64xf32, #tpu.memory_space<vmem>>, vector<1x64x16xf32>
    %153 = vector.shape_cast %152 : vector<1x64x16xf32> to vector<64x16xf32>
    %c1_65 = arith.constant 1 : index
    %c112_66 = arith.constant 112 : index
    %c0_67 = arith.constant 0 : index
    %154 = vector.load %arg4[%c1_65, %c112_66, %c0_67] : memref<2x120x64xf32, #tpu.memory_space<vmem>>, vector<1x1x48xf32>
    %155 = vector.shape_cast %154 : vector<1x1x48xf32> to vector<1x48xf32>
    %c1_68 = arith.constant 1 : index
    %c113_69 = arith.constant 113 : index
    %c0_70 = arith.constant 0 : index
    %156 = vector.load %arg4[%c1_68, %c113_69, %c0_70] : memref<2x120x64xf32, #tpu.memory_space<vmem>>, vector<1x1x16xf32>
    %157 = vector.shape_cast %156 : vector<1x1x16xf32> to vector<1x16xf32>
    %c1_71 = arith.constant 1 : index
    %c114_72 = arith.constant 114 : index
    %c0_73 = arith.constant 0 : index
    %158 = vector.load %arg4[%c1_71, %c114_72, %c0_73] : memref<2x120x64xf32, #tpu.memory_space<vmem>>, vector<1x1x64xf32>
    %159 = vector.shape_cast %158 : vector<1x1x64xf32> to vector<1x64xf32>
    %c1_74 = arith.constant 1 : index
    %c115_75 = arith.constant 115 : index
    %c0_76 = arith.constant 0 : index
    %160 = vector.load %arg4[%c1_74, %c115_75, %c0_76] : memref<2x120x64xf32, #tpu.memory_space<vmem>>, vector<1x1x16xf32>
    %161 = vector.shape_cast %160 : vector<1x1x16xf32> to vector<1x16xf32>
    %c1_77 = arith.constant 1 : index
    %c116_78 = arith.constant 116 : index
    %c0_79 = arith.constant 0 : index
    %162 = vector.load %arg4[%c1_77, %c116_78, %c0_79] : memref<2x120x64xf32, #tpu.memory_space<vmem>>, vector<1x1x16xf32>
    %163 = vector.shape_cast %162 : vector<1x1x16xf32> to vector<1x16xf32>
    %c1_80 = arith.constant 1 : index
    %c117_81 = arith.constant 117 : index
    %c0_82 = arith.constant 0 : index
    %164 = vector.load %arg4[%c1_80, %c117_81, %c0_82] : memref<2x120x64xf32, #tpu.memory_space<vmem>>, vector<1x1x16xf32>
    %165 = vector.shape_cast %164 : vector<1x1x16xf32> to vector<1x16xf32>
    %c1_83 = arith.constant 1 : index
    %c118_84 = arith.constant 118 : index
    %c0_85 = arith.constant 0 : index
    %166 = vector.load %arg4[%c1_83, %c118_84, %c0_85] : memref<2x120x64xf32, #tpu.memory_space<vmem>>, vector<1x1x16xf32>
    %167 = vector.shape_cast %166 : vector<1x1x16xf32> to vector<1x16xf32>
    %c1_86 = arith.constant 1 : index
    %c119_87 = arith.constant 119 : index
    %c0_88 = arith.constant 0 : index
    %168 = vector.load %arg4[%c1_86, %c119_87, %c0_88] : memref<2x120x64xf32, #tpu.memory_space<vmem>>, vector<1x1x16xf32>
    %169 = vector.shape_cast %168 : vector<1x1x16xf32> to vector<1x16xf32>
    %cst_89 = arith.constant dense<0.000000e+00> : vector<16x48xf32>
    %170 = tpu.matmul %145, %147, %cst_89 {dimension_numbers = #tpu.dot_dimension_numbers<[1], [0], [0], [1], [0, 0, 1, 1], [], []>} : vector<16x16xf32>, vector<16x48xf32>, vector<16x48xf32> -> vector<16x48xf32>
    %171 = vector.broadcast %155 : vector<1x48xf32> to vector<16x48xf32>
    %172 = arith.addf %170, %171 : vector<16x48xf32>
    %173 = vector.extract_strided_slice %172 {offsets = [0, 0], sizes = [16, 16], strides = [1, 1]} : vector<16x48xf32> to vector<16x16xf32>
    %174 = vector.extract_strided_slice %172 {offsets = [0, 16], sizes = [16, 16], strides = [1, 1]} : vector<16x48xf32> to vector<16x16xf32>
    %175 = vector.extract_strided_slice %172 {offsets = [0, 32], sizes = [16, 16], strides = [1, 1]} : vector<16x48xf32> to vector<16x16xf32>
    %176 = vector.extract_strided_slice %173 {offsets = [0, 0], sizes = [8, 16], strides = [1, 1]} : vector<16x16xf32> to vector<8x16xf32>
    %177 = vector.extract_strided_slice %174 {offsets = [0, 0], sizes = [8, 16], strides = [1, 1]} : vector<16x16xf32> to vector<8x16xf32>
    %178 = vector.extract_strided_slice %175 {offsets = [0, 0], sizes = [8, 16], strides = [1, 1]} : vector<16x16xf32> to vector<8x16xf32>
    %179 = vector.shape_cast %176 : vector<8x16xf32> to vector<8x1x16xf32>
    %180 = vector.shape_cast %177 : vector<8x16xf32> to vector<1x8x16xf32>
    %181 = vector.broadcast %179 : vector<8x1x16xf32> to vector<8x8x16xf32>
    %182 = vector.broadcast %180 : vector<1x8x16xf32> to vector<8x8x16xf32>
    %183 = arith.mulf %181, %182 : vector<8x8x16xf32>
    %cst_90 = arith.constant dense<0xFF800000> : vector<8x16xf32>
    %184 = vector.multi_reduction <maximumf>, %183, %cst_90 [1] : vector<8x8x16xf32> to vector<8x16xf32>
    %185 = vector.shape_cast %184 : vector<8x16xf32> to vector<8x1x16xf32>
    %186 = vector.broadcast %185 : vector<8x1x16xf32> to vector<8x8x16xf32>
    %187 = arith.subf %183, %186 : vector<8x8x16xf32>
    %188 = math.exp %187 : vector<8x8x16xf32>
    %cst_91 = arith.constant dense<0.000000e+00> : vector<8x16xf32>
    %189 = vector.multi_reduction <add>, %188, %cst_91 [1] : vector<8x8x16xf32> to vector<8x16xf32>
    %190 = vector.shape_cast %189 : vector<8x16xf32> to vector<8x1x16xf32>
    %191 = tpu.reciprocal %190 {approx = true} : vector<8x1x16xf32> -> vector<8x1x16xf32>
    %192 = vector.broadcast %191 : vector<8x1x16xf32> to vector<8x8x16xf32>
    %193 = arith.mulf %188, %192 : vector<8x8x16xf32>
    %194 = vector.shape_cast %178 : vector<8x16xf32> to vector<1x8x16xf32>
    %195 = vector.broadcast %194 : vector<1x8x16xf32> to vector<8x8x16xf32>
    %196 = arith.mulf %193, %195 : vector<8x8x16xf32>
    %cst_92 = arith.constant dense<0.000000e+00> : vector<8x16xf32>
    %197 = vector.multi_reduction <add>, %196, %cst_92 [1] : vector<8x8x16xf32> to vector<8x16xf32>
    %198 = vector.extract_strided_slice %173 {offsets = [8, 0], sizes = [8, 16], strides = [1, 1]} : vector<16x16xf32> to vector<8x16xf32>
    %199 = vector.extract_strided_slice %174 {offsets = [8, 0], sizes = [8, 16], strides = [1, 1]} : vector<16x16xf32> to vector<8x16xf32>
    %200 = vector.extract_strided_slice %175 {offsets = [8, 0], sizes = [8, 16], strides = [1, 1]} : vector<16x16xf32> to vector<8x16xf32>
    %201 = vector.shape_cast %198 : vector<8x16xf32> to vector<8x1x16xf32>
    %202 = vector.shape_cast %199 : vector<8x16xf32> to vector<1x8x16xf32>
    %203 = vector.broadcast %201 : vector<8x1x16xf32> to vector<8x8x16xf32>
    %204 = vector.broadcast %202 : vector<1x8x16xf32> to vector<8x8x16xf32>
    %205 = arith.mulf %203, %204 : vector<8x8x16xf32>
    %cst_93 = arith.constant dense<0xFF800000> : vector<8x16xf32>
    %206 = vector.multi_reduction <maximumf>, %205, %cst_93 [1] : vector<8x8x16xf32> to vector<8x16xf32>
    %207 = vector.shape_cast %206 : vector<8x16xf32> to vector<8x1x16xf32>
    %208 = vector.broadcast %207 : vector<8x1x16xf32> to vector<8x8x16xf32>
    %209 = arith.subf %205, %208 : vector<8x8x16xf32>
    %210 = math.exp %209 : vector<8x8x16xf32>
    %cst_94 = arith.constant dense<0.000000e+00> : vector<8x16xf32>
    %211 = vector.multi_reduction <add>, %210, %cst_94 [1] : vector<8x8x16xf32> to vector<8x16xf32>
    %212 = vector.shape_cast %211 : vector<8x16xf32> to vector<8x1x16xf32>
    %213 = tpu.reciprocal %212 {approx = true} : vector<8x1x16xf32> -> vector<8x1x16xf32>
    %214 = vector.broadcast %213 : vector<8x1x16xf32> to vector<8x8x16xf32>
    %215 = arith.mulf %210, %214 : vector<8x8x16xf32>
    %216 = vector.shape_cast %200 : vector<8x16xf32> to vector<1x8x16xf32>
    %217 = vector.broadcast %216 : vector<1x8x16xf32> to vector<8x8x16xf32>
    %218 = arith.mulf %215, %217 : vector<8x8x16xf32>
    %cst_95 = arith.constant dense<0.000000e+00> : vector<8x16xf32>
    %219 = vector.multi_reduction <add>, %218, %cst_95 [1] : vector<8x8x16xf32> to vector<8x16xf32>
    %220 = tpu.concatenate %197, %219 in 0 : vector<8x16xf32>, vector<8x16xf32> -> vector<16x16xf32>
    %cst_96 = arith.constant dense<0.000000e+00> : vector<16x16xf32>
    %221 = tpu.matmul %220, %149, %cst_96 {dimension_numbers = #tpu.dot_dimension_numbers<[1], [0], [0], [1], [0, 0, 1, 1], [], []>} : vector<16x16xf32>, vector<16x16xf32>, vector<16x16xf32> -> vector<16x16xf32>
    %222 = vector.broadcast %157 : vector<1x16xf32> to vector<16x16xf32>
    %223 = arith.addf %221, %222 : vector<16x16xf32>
    %224 = arith.addf %145, %223 : vector<16x16xf32>
    %cst_97 = arith.constant dense<0.000000e+00> : vector<16xf32>
    %225 = vector.multi_reduction <add>, %224, %cst_97 [1] : vector<16x16xf32> to vector<16xf32>
    %226 = vector.shape_cast %225 : vector<16xf32> to vector<16x1xf32>
    %cst_98 = arith.constant 1.600000e+01 : f32
    %227 = vector.broadcast %cst_98 : f32 to vector<16x1xf32>
    %228 = arith.divf %226, %227 : vector<16x1xf32>
    %229 = vector.broadcast %228 : vector<16x1xf32> to vector<16x16xf32>
    %230 = arith.subf %224, %229 : vector<16x16xf32>
    %231 = arith.mulf %230, %230 : vector<16x16xf32>
    %cst_99 = arith.constant dense<0.000000e+00> : vector<16xf32>
    %232 = vector.multi_reduction <add>, %231, %cst_99 [1] : vector<16x16xf32> to vector<16xf32>
    %233 = vector.shape_cast %232 : vector<16xf32> to vector<16x1xf32>
    %cst_100 = arith.constant 0.0666666701 : f32
    %234 = vector.broadcast %cst_100 : f32 to vector<16x1xf32>
    %235 = arith.mulf %233, %234 : vector<16x1xf32>
    %236 = math.sqrt %235 : vector<16x1xf32>
    %cst_101 = arith.constant 9.99999997E-7 : f32
    %237 = vector.broadcast %cst_101 : f32 to vector<16x1xf32>
    %238 = arith.addf %236, %237 : vector<16x1xf32>
    %239 = tpu.reciprocal %238 {approx = true} : vector<16x1xf32> -> vector<16x1xf32>
    %240 = vector.broadcast %163 : vector<1x16xf32> to vector<16x16xf32>
    %241 = arith.mulf %240, %230 : vector<16x16xf32>
    %242 = vector.broadcast %239 : vector<16x1xf32> to vector<16x16xf32>
    %243 = arith.mulf %241, %242 : vector<16x16xf32>
    %244 = vector.broadcast %165 : vector<1x16xf32> to vector<16x16xf32>
    %245 = arith.addf %243, %244 : vector<16x16xf32>
    %cst_102 = arith.constant dense<0.000000e+00> : vector<16x64xf32>
    %246 = tpu.matmul %245, %151, %cst_102 {dimension_numbers = #tpu.dot_dimension_numbers<[1], [0], [0], [1], [0, 0, 1, 1], [], []>} : vector<16x16xf32>, vector<16x64xf32>, vector<16x64xf32> -> vector<16x64xf32>
    %247 = vector.broadcast %159 : vector<1x64xf32> to vector<16x64xf32>
    %248 = arith.addf %246, %247 : vector<16x64xf32>
    %cst_103 = arith.constant 5.000000e-01 : f32
    %249 = vector.broadcast %cst_103 : f32 to vector<16x64xf32>
    %250 = arith.mulf %249, %248 : vector<16x64xf32>
    %cst_104 = arith.constant 4.471500e-02 : f32
    %251 = vector.broadcast %cst_104 : f32 to vector<16x64xf32>
    %252 = arith.mulf %251, %248 : vector<16x64xf32>
    %253 = arith.mulf %252, %248 : vector<16x64xf32>
    %254 = arith.mulf %253, %248 : vector<16x64xf32>
    %255 = arith.addf %248, %254 : vector<16x64xf32>
    %cst_105 = arith.constant 0.797884583 : f32
    %256 = vector.broadcast %cst_105 : f32 to vector<16x64xf32>
    %257 = arith.mulf %256, %255 : vector<16x64xf32>
    %258 = math.tanh %257 : vector<16x64xf32>
    %cst_106 = arith.constant 1.000000e+00 : f32
    %259 = vector.broadcast %cst_106 : f32 to vector<16x64xf32>
    %260 = arith.addf %259, %258 : vector<16x64xf32>
    %261 = arith.mulf %250, %260 : vector<16x64xf32>
    %cst_107 = arith.constant dense<0.000000e+00> : vector<16x16xf32>
    %262 = tpu.matmul %261, %153, %cst_107 {dimension_numbers = #tpu.dot_dimension_numbers<[1], [0], [0], [1], [0, 0, 1, 1], [], []>} : vector<16x64xf32>, vector<64x16xf32>, vector<16x16xf32> -> vector<16x16xf32>
    %263 = vector.broadcast %161 : vector<1x16xf32> to vector<16x16xf32>
    %264 = arith.addf %262, %263 : vector<16x16xf32>
    %265 = arith.addf %245, %264 : vector<16x16xf32>
    %cst_108 = arith.constant dense<0.000000e+00> : vector<16xf32>
    %266 = vector.multi_reduction <add>, %265, %cst_108 [1] : vector<16x16xf32> to vector<16xf32>
    %267 = vector.shape_cast %266 : vector<16xf32> to vector<16x1xf32>
    %cst_109 = arith.constant 1.600000e+01 : f32
    %268 = vector.broadcast %cst_109 : f32 to vector<16x1xf32>
    %269 = arith.divf %267, %268 : vector<16x1xf32>
    %270 = vector.broadcast %269 : vector<16x1xf32> to vector<16x16xf32>
    %271 = arith.subf %265, %270 : vector<16x16xf32>
    %272 = arith.mulf %271, %271 : vector<16x16xf32>
    %cst_110 = arith.constant dense<0.000000e+00> : vector<16xf32>
    %273 = vector.multi_reduction <add>, %272, %cst_110 [1] : vector<16x16xf32> to vector<16xf32>
    %274 = vector.shape_cast %273 : vector<16xf32> to vector<16x1xf32>
    %cst_111 = arith.constant 0.0666666701 : f32
    %275 = vector.broadcast %cst_111 : f32 to vector<16x1xf32>
    %276 = arith.mulf %274, %275 : vector<16x1xf32>
    %277 = math.sqrt %276 : vector<16x1xf32>
    %cst_112 = arith.constant 9.99999997E-7 : f32
    %278 = vector.broadcast %cst_112 : f32 to vector<16x1xf32>
    %279 = arith.addf %277, %278 : vector<16x1xf32>
    %280 = tpu.reciprocal %279 {approx = true} : vector<16x1xf32> -> vector<16x1xf32>
    %281 = vector.broadcast %167 : vector<1x16xf32> to vector<16x16xf32>
    %282 = arith.mulf %281, %271 : vector<16x16xf32>
    %283 = vector.broadcast %280 : vector<16x1xf32> to vector<16x16xf32>
    %284 = arith.mulf %282, %283 : vector<16x16xf32>
    %285 = vector.broadcast %169 : vector<1x16xf32> to vector<16x16xf32>
    %286 = arith.addf %284, %285 : vector<16x16xf32>
    %c0_113 = arith.constant 0 : index
    %c0_114 = arith.constant 0 : index
    %287 = vector.load %arg8[%c0_113, %c0_114] : memref<16x16xf32, #tpu.memory_space<vmem>>, vector<16x16xf32>
    tpu.vector_store %arg8[%c0_113, %c0_114], %286 {strides = array<i32>} : memref<16x16xf32, #tpu.memory_space<vmem>>, vector<16x16xf32>,
    %c0_115 = arith.constant 0 : index
    %c0_116 = arith.constant 0 : index
    %288 = vector.load %arg5[%c0_115, %c0_116] : memref<16x4xf32, #tpu.memory_space<vmem>>, vector<16x4xf32>
    %cst_117 = arith.constant dense<0.000000e+00> : vector<16x4xf32>
    %289 = tpu.matmul %286, %288, %cst_117 {dimension_numbers = #tpu.dot_dimension_numbers<[1], [0], [0], [1], [0, 0, 1, 1], [], []>} : vector<16x16xf32>, vector<16x4xf32>, vector<16x4xf32> -> vector<16x4xf32>
    %c0_118 = arith.constant 0 : index
    %c0_119 = arith.constant 0 : index
    %290 = vector.load %arg6[%c0_118, %c0_119] : memref<1x4xf32, #tpu.memory_space<vmem>>, vector<1x4xf32>
    %291 = vector.broadcast %290 : vector<1x4xf32> to vector<16x4xf32>
    %292 = arith.addf %289, %291 : vector<16x4xf32>
    %c0_120 = arith.constant 0 : index
    %c0_121 = arith.constant 0 : index
    %293 = vector.load %arg7[%c0_120, %c0_121] : memref<16x4xf32, #tpu.memory_space<vmem>>, vector<16x4xf32>
    tpu.vector_store %arg7[%c0_120, %c0_121], %292 {strides = array<i32>} : memref<16x4xf32, #tpu.memory_space<vmem>>, vector<16x4xf32>,
    return
  }
  func.func @transform_0(%arg0: i32) -> (i32, i32) {
    %c0_i32 = arith.constant 0 : i32
    %c0_i32_0 = arith.constant 0 : i32
    %c0_i32_1 = arith.constant 0 : i32
    return %c0_i32, %c0_i32_0 : i32, i32
  }
  func.func @transform_1(%arg0: i32) -> (i32, i32) {
    %c0_i32 = arith.constant 0 : i32
    %c0_i32_0 = arith.constant 0 : i32
    %c0_i32_1 = arith.constant 0 : i32
    return %c0_i32, %c0_i32_0 : i32, i32
  }
  func.func @transform_2(%arg0: i32) -> (i32, i32) {
    %c0_i32 = arith.constant 0 : i32
    %c0_i32_0 = arith.constant 0 : i32
    %c0_i32_1 = arith.constant 0 : i32
    return %c0_i32, %c0_i32_0 : i32, i32
  }
  func.func @transform_3(%arg0: i32) -> (i32, i32, i32) {
    %c0_i32 = arith.constant 0 : i32
    %c0_i32_0 = arith.constant 0 : i32
    %c0_i32_1 = arith.constant 0 : i32
    %c0_i32_2 = arith.constant 0 : i32
    return %c0_i32, %c0_i32_0, %c0_i32_1 : i32, i32, i32
  }
  func.func @transform_4(%arg0: i32) -> (i32, i32) {
    %c0_i32 = arith.constant 0 : i32
    %c0_i32_0 = arith.constant 0 : i32
    %c0_i32_1 = arith.constant 0 : i32
    return %c0_i32, %c0_i32_0 : i32, i32
  }
  func.func @transform_5(%arg0: i32) -> (i32, i32) {
    %c0_i32 = arith.constant 0 : i32
    %c0_i32_0 = arith.constant 0 : i32
    %c0_i32_1 = arith.constant 0 : i32
    return %c0_i32, %c0_i32_0 : i32, i32
  }
  func.func @transform_6(%arg0: i32) -> (i32, i32) {
    %c0_i32 = arith.constant 0 : i32
    %c0_i32_0 = arith.constant 0 : i32
    %c0_i32_1 = arith.constant 0 : i32
    return %c0_i32, %c0_i32_0 : i32, i32
  }
  func.func @transform_7(%arg0: i32) -> (i32, i32) {
    %c0_i32 = arith.constant 0 : i32
    %c0_i32_0 = arith.constant 0 : i32
    %c0_i32_1 = arith.constant 0 : i32
    return %c0_i32, %c0_i32_0 : i32, i32
  }
}

</mosaic_0001>

<bundles_post_ra>
// kernel: transformer_forward.1
= control target key start
LH: loop header
LB: loop body
LE: loop exit
PB: predicated region body
PF: predicated region fallthrough
CT: control target
= control target key end

     0   :  { %vm38_vm0 = vcmask 1043456   ;;  %vm31_vm1 = vcmask 31744   ;;  %s2884_s0 = inlined_call_operand.vmem [shape: f32[16,4], index: 0, kind: input, shape index: {}]   ;;  %s2885_s1 = inlined_call_operand.vmem [shape: f32[4,16], index: 1, kind: input, shape index: {}]   ;;  %s2886_s2 = inlined_call_operand.vmem [shape: f32[16,16], index: 2, kind: input, shape index: {}]   ;;  %s2887_s3 = inlined_call_operand.vmem [shape: f32[2,120,64], index: 3, kind: input, shape index: {}]   ;;  %s2888_s4 = inlined_call_operand.vmem [shape: f32[16,4], index: 4, kind: input, shape index: {}]   ;;  %s2889_s5 = inlined_call_operand.vmem [shape: f32[1,4], index: 5, kind: input, shape index: {}]   ;;  %s2890_s6 = inlined_call_operand.vmem [shape: f32[16,4], index: 6, kind: output, shape index: {0}]   ;;  %s2891_s7 = inlined_call_operand.hbm [shape: f32[16,16], index: 7, kind: output, shape index: {1}]  }
   0x1   :  { %v28_v0 = vld [vmem:[%s2885_s1] sm:$0xf]  ;;  %v27_v2 = vld [vmem:[%s2884_s0 + $0x8] sm:$0xff] }
   0x2   :  { %v26_v1 = vld [vmem:[%s2884_s0] sm:$0xff]  ;;  %1767 = vmatpush.msk.msra.mxu0 %vm38_vm0, %v28_v0 }
   0x3   :  { %1768 = vmatmul.msk.f32.vlgmr.msra.gmra.mxu0 %vm31_vm1, %v26_v1 }
   0x4   :  { %13 = vsyncpa [#allocation3], 0  ;;  %v66_v3 = vld [vmem:[%s2887_s3 + $0x8] sm:$0xff]  ;;  %v65_v4 = vld [vmem:[%s2887_s3] sm:$0xff]  ;;  %vm88_vm2 = vcmask 130048   ;;  %s2039_s15 = smov 96  }
   0x5   :  { %109 = vmatpush.msra.mxu1 %v66_v3  ;;  %1810 = vmatpush.msra.mxu2 %v66_v3  ;;  %v29_v5 = vld [vmem:[%s2886_s2] sm:$0xff]  ;;  %v30_v8 = vld [vmem:[%s2886_s2 + $0x8] sm:$0xff]  ;;  %v1826_v11 = vld [vmem:[%s2887_s3 + $0x70] ss:$0 sm:$0xff]  ;;  %s2040_s16 = smov 112   ;;  %vm634_vm3 = vcmask 1041409  }
   0x6   :  { %vm636_vm4 = vcmask 1042434   ;;  %vm638_vm5 = vcmask 1043459   ;;  %vm640_vm6 = vcmask 1044484   ;;  %vm642_vm7 = vcmask 1045509   ;;  %s1753_s26 = sshll.u32 %s2891_s7, 4  ;;  %s2042_s27 = smov [#allocation2]   ;;  %s1754_s26 = int_to_ptr.hbm [resolvable:$true] %s1753_s26 }
   0x7   :  { %110 = vmatpush.msra.mxu1 %v65_v4  ;;  %1811 = vmatpush.msra.mxu2 %v65_v4  ;;  %vm644_vm8 = vcmask 1046534   ;;  %vm646_vm9 = vcmask 1047559   ;;  %vm805_vm15 = vcmask 523264   ;;  %s1751_s28 = sshll.u32 %s2042_s27, 4  ;;  %s2043_s29 = smov 128   ;;  %s1752_s28 = int_to_ptr.vmem [resolvable:$true] %s1751_s28 }
   0x8   :  { %s2044_s30 = smov 8  }
   0xb   :  { %1769 = vmatmul.msk.f32.gmra.mxu0 %vm31_vm1, %v27_v2 }
  0x80   :  { %v59_v6 = vpop.f32.mrf.mxu0 }
  0x81   :  { %v2105_v7 = vadd.f32 %v59_v6, %v29_v5 }
  0x83   :  { %1770 = vmatmul.msk.f32.vlgmr.msra.gmra.mxu1 %vm88_vm2, %v2105_v7 }
  0x88   :  { %v62_v9 = vpop.f32.mrf.mxu0 }
  0x89   :  { %v2112_v10 = vadd.f32 %v62_v9, %v30_v8 }
  0x8b   :  { %1771 = vmatmul.msk.f32.vlgmr.msra.gmra.mxu2 %vm88_vm2, %v2112_v10 }
 0x100   :  { %v112_v12 = vpop.f32.mrf.mxu1 }
 0x101   :  { %v113_v13 = vadd.f32 %v1826_v11, %v112_v12 }
 0x103   :  { %305 = vrot.lane.b32.xlu1 %v113_v13, %s2039_s15  ;;  %142 = vrot.lane.b32.xlu0 %v113_v13, %s2040_s16  ;;  %v119_v16 = vrot.slane %v113_v13, 1  ;;  %v120_v17 = vrot.slane %v113_v13, 2  ;;  %v121_v18 = vrot.slane %v113_v13, 3  ;;  %v122_v19 = vrot.slane %v113_v13, 4 }
 0x104   :  { %v123_v20 = vrot.slane %v113_v13, 5  ;;  %v124_v21 = vrot.slane %v113_v13, 6  ;;  %v125_v22 = vrot.slane %v113_v13, 7  ;;  %v126_v26 = vperm.slane %v113_v13, 0 }
 0x105   :  { %v127_v27 = vperm.slane %v119_v16, 0  ;;  %v128_v28 = vperm.slane %v120_v17, 0  ;;  %v129_v29 = vperm.slane %v121_v18, 0  ;;  %v130_v30 = vperm.slane %v122_v19, 0 }
 0x106   :  { %v131_v31 = vperm.slane %v123_v20, 0  ;;  %v132_v32 = vperm.slane %v124_v21, 0  ;;  %v133_v33 = vperm.slane %v125_v22, 0 }
 0x10e   :  { %v115_v14 = vpop.f32.mrf.mxu2 }
 0x10f   :  { %v2121_v15 = vadd.f32 %v1826_v11, %v115_v14 }
 0x111   :  { %559 = vrot.lane.b32.xlu1 %v2121_v15, %s2039_s15  ;;  %396 = vrot.lane.b32.xlu0 %v2121_v15, %s2040_s16  ;;  %v373_v23 = vrot.slane %v2121_v15, 1  ;;  %v374_v24 = vrot.slane %v2121_v15, 2  ;;  %v375_v25 = vrot.slane %v2121_v15, 3  ;;  %v376_v34 = vrot.slane %v2121_v15, 4 }
 0x112   :  { %v377_v35 = vrot.slane %v2121_v15, 5  ;;  %v378_v36 = vrot.slane %v2121_v15, 6  ;;  %v379_v37 = vrot.slane %v2121_v15, 7  ;;  %v380_v39 = vperm.slane %v2121_v15, 0 }
 0x113   :  { %v2135_v40 = vperm.slane %v373_v23, 0  ;;  %v2137_v41 = vperm.slane %v374_v24, 0  ;;  %v2139_v42 = vperm.slane %v375_v25, 0 }
 0x175   :  { %v143_v38 = vpop.permute.xlu0 %142 }
 0x176   :  { %v2141_v43 = vmul.f32 %v143_v38, %v126_v26  ;;  %v2143_v44 = vmul.f32 %v143_v38, %v127_v27  ;;  %v2145_v45 = vmul.f32 %v143_v38, %v128_v28  ;;  %v2147_v46 = vmul.f32 %v143_v38, %v129_v29 }
 0x177   :  { %v2149_v47 = vmul.f32 %v143_v38, %v130_v30  ;;  %v2151_v48 = vmul.f32 %v143_v38, %v131_v31  ;;  %v2153_v49 = vmul.f32 %v143_v38, %v132_v32  ;;  %v2155_v50 = vmul.f32 %v143_v38, %v133_v33 }
 0x178   :  { %v153_v51 = vsel %vm88_vm2, %v2141_v43, -inf  ;;  %v160_v52 = vsel %vm88_vm2, %v2143_v44, -inf  ;;  %v167_v53 = vsel %vm88_vm2, %v2145_v45, -inf  ;;  %v174_v54 = vsel %vm88_vm2, %v2147_v46, -inf }
 0x179   :  { %v154_v55 = vrot.slane %v153_v51, 4  ;;  %v161_v56 = vrot.slane %v160_v52, 4  ;;  %v168_v57 = vrot.slane %v167_v53, 4  ;;  %v175_v58 = vrot.slane %v174_v54, 4 }
 0x17a   :  { %v181_v59 = vsel %vm88_vm2, %v2149_v47, -inf  ;;  %v188_v60 = vsel %vm88_vm2, %v2151_v48, -inf  ;;  %v195_v61 = vsel %vm88_vm2, %v2153_v49, -inf  ;;  %v202_v62 = vsel %vm88_vm2, %v2155_v50, -inf }
 0x17b   :  { %v155_v63 = vmax.f32 %v153_v51, %v154_v55  ;;  %v162_v0 = vmax.f32 %v160_v52, %v161_v56  ;;  %v169_v1 = vmax.f32 %v167_v53, %v168_v57  ;;  %v176_v2 = vmax.f32 %v174_v54, %v175_v58 }
 0x17c   :  { %v182_v3 = vrot.slane %v181_v59, 4  ;;  %v189_v4 = vrot.slane %v188_v60, 4  ;;  %v196_v5 = vrot.slane %v195_v61, 4  ;;  %v203_v6 = vrot.slane %v202_v62, 4 }
 0x17d   :  { %v156_v8 = vrot.slane %v155_v63, 2  ;;  %v163_v9 = vrot.slane %v162_v0, 2  ;;  %v170_v11 = vrot.slane %v169_v1, 2  ;;  %v177_v12 = vrot.slane %v176_v2, 2 }
 0x17e   :  { %v183_v13 = vmax.f32 %v181_v59, %v182_v3  ;;  %v190_v14 = vmax.f32 %v188_v60, %v189_v4  ;;  %v197_v16 = vmax.f32 %v195_v61, %v196_v5  ;;  %v204_v17 = vmax.f32 %v202_v62, %v203_v6 }
 0x17f   :  { %v157_v18 = vmax.f32 %v155_v63, %v156_v8  ;;  %v164_v19 = vmax.f32 %v162_v0, %v163_v9  ;;  %v171_v20 = vmax.f32 %v169_v1, %v170_v11  ;;  %v178_v21 = vmax.f32 %v176_v2, %v177_v12 }
 0x180   :  { %v184_v22 = vrot.slane %v183_v13, 2  ;;  %v191_v23 = vrot.slane %v190_v14, 2  ;;  %v198_v24 = vrot.slane %v197_v16, 2  ;;  %v205_v25 = vrot.slane %v204_v17, 2 }
 0x181   :  { %v158_v26 = vrot.slane %v157_v18, 1  ;;  %v165_v27 = vrot.slane %v164_v19, 1  ;;  %v172_v28 = vrot.slane %v171_v20, 1  ;;  %v179_v29 = vrot.slane %v178_v21, 1 }
 0x182   :  { %v185_v30 = vmax.f32 %v183_v13, %v184_v22  ;;  %v192_v31 = vmax.f32 %v190_v14, %v191_v23  ;;  %v199_v32 = vmax.f32 %v197_v16, %v198_v24  ;;  %v206_v33 = vmax.f32 %v204_v17, %v205_v25 }
 0x183   :  { %v159_v38 = vmax.f32 %v157_v18, %v158_v26  ;;  %v166_v51 = vmax.f32 %v164_v19, %v165_v27  ;;  %v173_v52 = vmax.f32 %v171_v20, %v172_v28  ;;  %v180_v53 = vmax.f32 %v178_v21, %v179_v29  ;;  %v397_v58 = vpop.permute.xlu0 %396 }
 0x184   :  { %v186_v54 = vrot.slane %v185_v30, 1  ;;  %v193_v55 = vrot.slane %v192_v31, 1  ;;  %v200_v56 = vrot.slane %v199_v32, 1  ;;  %v207_v57 = vrot.slane %v206_v33, 1 }
 0x185   :  { %v209_v59 = vsub.f32 %v2141_v43, %v159_v38  ;;  %v210_v60 = vsub.f32 %v2143_v44, %v166_v51  ;;  %v211_v61 = vsub.f32 %v2145_v45, %v173_v52  ;;  %v212_v62 = vsub.f32 %v2147_v46, %v180_v53 }
 0x186   :  { %v187_v63 = vmax.f32 %v185_v30, %v186_v54  ;;  %v194_v0 = vmax.f32 %v192_v31, %v193_v55  ;;  %v201_v1 = vmax.f32 %v199_v32, %v200_v56  ;;  %v208_v2 = vmax.f32 %v206_v33, %v207_v57 }
 0x187   :  { %v217_v3 = vmul.f32 1.442695, %v209_v59  ;;  %v219_v4 = vmul.f32 1.442695, %v210_v60  ;;  %v221_v5 = vmul.f32 1.442695, %v211_v61  ;;  %v2179_v6 = vmul.f32 %v397_v58, %v380_v39 }
 0x188   :  { %v213_v8 = vsub.f32 %v2149_v47, %v187_v63  ;;  %v214_v43 = vsub.f32 %v2151_v48, %v194_v0  ;;  %v215_v44 = vsub.f32 %v2153_v49, %v201_v1  ;;  %v216_v45 = vsub.f32 %v2155_v50, %v208_v2 }
 0x189   :  { %1843 = vpow2.f32 %v217_v3  ;;  %v223_v46 = vmul.f32 1.442695, %v212_v62  ;;  %v2186_v9 = vmul.f32 %v397_v58, %v2135_v40  ;;  %v2189_v11 = vmul.f32 %v397_v58, %v2137_v41 }
 0x18a   :  { %1845 = vpow2.f32 %v219_v4  ;;  %v225_v12 = vmul.f32 1.442695, %v213_v8  ;;  %v227_v39 = vmul.f32 1.442695, %v214_v43  ;;  %v384_v47 = vperm.slane %v376_v34, 0 }
 0x18b   :  { %1847 = vpow2.f32 %v221_v5  ;;  %v229_v48 = vmul.f32 1.442695, %v215_v44  ;;  %v385_v49 = vperm.slane %v377_v35, 0  ;;  %v2196_v50 = vmul.f32 %v397_v58, %v2139_v42 }
 0x18c   :  { %1849 = vpow2.f32 %v223_v46  ;;  %v2198_v40 = vmul.f32 1.442695, %v216_v45  ;;  %v386_v41 = vperm.slane %v378_v36, 0  ;;  %v387_v13 = vperm.slane %v379_v37, 0 }
 0x18d   :  { %1851 = vpow2.f32 %v225_v12  ;;  %v407_v34 = vsel %vm88_vm2, %v2179_v6, -inf  ;;  %v414_v14 = vsel %vm88_vm2, %v2186_v9, -inf  ;;  %v421_v35 = vsel %vm88_vm2, %v2189_v11, -inf }
 0x18e   :  { %1853 = vpow2.f32 %v227_v39  ;;  %v408_v42 = vrot.slane %v407_v34, 4  ;;  %v415_v16 = vrot.slane %v414_v14, 4  ;;  %v422_v17 = vrot.slane %v421_v35, 4 }
 0x18f   :  { %v2210_v18 = vpop.eup %1843  ;;  %1855 = vpow2.f32 %v229_v48  ;;  %v2212_v36 = vmul.f32 %v397_v58, %v384_v47  ;;  %v2214_v15 = vmul.f32 %v397_v58, %v385_v49  ;;  %v428_v37 = vsel %vm88_vm2, %v2196_v50, -inf }
 0x190   :  { %v2218_v19 = vpop.eup %1845  ;;  %v233_v20 = vsel %vm88_vm2, %v2210_v18, 0.0  ;;  %v2222_v21 = vmul.f32 %v397_v58, %v386_v41  ;;  %v409_v22 = vmax.f32 %v407_v34, %v408_v42  ;;  %v416_v23 = vmax.f32 %v414_v14, %v415_v16  ;;  %v67_v34 = vld [vmem:[%s2887_s3 + $0x10] sm:$0xff] }
 0x191   :  { %v2224_v24 = vpop.eup %1847  ;;  %v234_v25 = vrot.slane %v233_v20, 4  ;;  %v240_v26 = vsel %vm88_vm2, %v2218_v19, 0.0  ;;  %v2228_v27 = vmul.f32 %v397_v58, %v387_v13  ;;  %v423_v28 = vmax.f32 %v421_v35, %v422_v17  ;;  %v68_v13 = vld [vmem:[%s2887_s3 + $0x18] sm:$0xff] }
 0x192   :  { %v2230_v29 = vpop.eup %1849  ;;  %v241_v30 = vrot.slane %v240_v26, 4  ;;  %v247_v31 = vsel %vm88_vm2, %v2224_v24, 0.0  ;;  %v410_v32 = vrot.slane %v409_v22, 2  ;;  %v429_v33 = vrot.slane %v428_v37, 4  ;;  %682 = vmatpush.msrb.mxu2 %v68_v13 }
 0x193   :  { %v2234_v38 = vpop.eup %1851  ;;  %v235_v51 = vadd.f32 %v234_v25, %v233_v20  ;;  %v248_v52 = vrot.slane %v247_v31, 4  ;;  %v254_v53 = vsel %vm88_vm2, %v2230_v29, 0.0  ;;  %v417_v54 = vrot.slane %v416_v23, 2 }
 0x194   :  { %v2238_v55 = vpop.eup %1853  ;;  %v242_v56 = vadd.f32 %v241_v30, %v240_v26  ;;  %v255_v57 = vrot.slane %v254_v53, 4  ;;  %v261_v58 = vsel %vm88_vm2, %v2234_v38, 0.0  ;;  %v411_v59 = vmax.f32 %v409_v22, %v410_v32  ;;  %683 = vmatpush.msrb.mxu2 %v67_v34 }
 0x195   :  { %v2242_v60 = vpop.eup %1855  ;;  %v236_v61 = vrot.slane %v235_v51, 2  ;;  %v249_v62 = vadd.f32 %v248_v52, %v247_v31  ;;  %v262_v63 = vrot.slane %v261_v58, 4  ;;  %v268_v0 = vsel %vm88_vm2, %v2238_v55, 0.0 }
 0x196   :  { %v243_v1 = vrot.slane %v242_v56, 2  ;;  %v256_v2 = vadd.f32 %v255_v57, %v254_v53  ;;  %v269_v3 = vrot.slane %v268_v0, 4  ;;  %v424_v4 = vrot.slane %v423_v28, 2 }
 0x197   :  { %v237_v5 = vadd.f32 %v236_v61, %v235_v51  ;;  %v250_v8 = vrot.slane %v249_v62, 2  ;;  %v263_v43 = vadd.f32 %v262_v63, %v261_v58  ;;  %v2248_v44 = vsel %vm88_vm2, %v2242_v60, 0.0 }
 0x198   :  { %v244_v45 = vadd.f32 %v243_v1, %v242_v56  ;;  %v257_v46 = vrot.slane %v256_v2, 2  ;;  %v2250_v12 = vadd.f32 %v269_v3, %v268_v0  ;;  %v412_v39 = vrot.slane %v411_v59, 1 }
 0x199   :  { %v238_v47 = vrot.slane %v237_v5, 1  ;;  %v251_v48 = vadd.f32 %v250_v8, %v249_v62  ;;  %v418_v49 = vmax.f32 %v416_v23, %v417_v54  ;;  %v435_v41 = vsel %vm88_vm2, %v2212_v36, -inf }
 0x19a   :  { %1857 = vpow2.f32 %v2198_v40  ;;  %v245_v14 = vrot.slane %v244_v45, 1  ;;  %v276_v35 = vrot.slane %v2248_v44, 4  ;;  %v442_v42 = vsel %vm88_vm2, %v2214_v15, -inf }
 0x19b   :  { %v239_v16 = vadd.f32 %v238_v47, %v237_v5  ;;  %v264_v17 = vrot.slane %v263_v43, 2  ;;  %v413_v20 = vmax.f32 %v411_v59, %v412_v39  ;;  %v419_v22 = vrot.slane %v418_v49, 1 }
 0x19c   :  { %v2264_v23 = vadd.f32 %v257_v46, %v256_v2  ;;  %v271_v25 = vrot.slane %v2250_v12, 2  ;;  %v425_v26 = vmax.f32 %v423_v28, %v424_v4  ;;  %v430_v30 = vmax.f32 %v428_v37, %v429_v33 }
 0x19d   :  { %v246_v31 = vadd.f32 %v245_v14, %v244_v45  ;;  %v252_v40 = vrot.slane %v251_v48, 1  ;;  %v420_v32 = vmax.f32 %v418_v49, %v419_v22  ;;  %v436_v51 = vrot.slane %v435_v41, 4 }
 0x19e   :  { %1859 = vrcp.f32 %v239_v16  ;;  %v426_v52 = vrot.slane %v425_v26, 1  ;;  %v431_v53 = vrot.slane %v430_v30, 2  ;;  %v443_v54 = vrot.slane %v442_v42, 4 }
 0x19f   :  { %v437_v56 = vmax.f32 %v435_v41, %v436_v51  ;;  %v449_v57 = vsel %vm88_vm2, %v2222_v21, -inf  ;;  %v456_v58 = vsel %vm88_vm2, %v2228_v27, -inf  ;;  %v463_v59 = vsub.f32 %v2179_v6, %v413_v20 }
 0x1a0   :  { %v2272_v28 = vpop.eup %1857  ;;  %v427_v37 = vmax.f32 %v425_v26, %v426_v52  ;;  %v432_v33 = vmax.f32 %v430_v30, %v431_v53  ;;  %v444_v61 = vmax.f32 %v442_v42, %v443_v54  ;;  %v450_v62 = vrot.slane %v449_v57, 4 }
 0x1a1   :  { %v438_v63 = vrot.slane %v437_v56, 2  ;;  %v457_v0 = vrot.slane %v456_v58, 4  ;;  %v464_v1 = vsub.f32 %v2186_v9, %v420_v32  ;;  %v471_v2 = vmul.f32 1.442695, %v463_v59 }
 0x1a2   :  { %v433_v3 = vrot.slane %v432_v33, 1  ;;  %v445_v4 = vrot.slane %v444_v61, 2  ;;  %v451_v5 = vmax.f32 %v449_v57, %v450_v62  ;;  %v465_v8 = vsub.f32 %v2189_v11, %v427_v37 }
 0x1a3   :  { %v439_v45 = vmax.f32 %v437_v56, %v438_v63  ;;  %v458_v46 = vmax.f32 %v456_v58, %v457_v0  ;;  %1861 = vpow2.f32 %v471_v2  ;;  %v473_v6 = vmul.f32 1.442695, %v464_v1 }
 0x1a4   :  { %v1860_v39 = vpop.eup %1859  ;;  %v2276_v47 = vadd.f32 %v264_v17, %v263_v43  ;;  %v434_v49 = vmax.f32 %v432_v33, %v433_v3  ;;  %v446_v41 = vmax.f32 %v444_v61, %v445_v4  ;;  %v452_v13 = vrot.slane %v451_v5, 2 }
 0x1a5   :  { %v259_v34 = vrot.slane %v2264_v23, 1  ;;  %v440_v14 = vrot.slane %v439_v45, 1  ;;  %v459_v9 = vrot.slane %v458_v46, 2  ;;  %1863 = vpow2.f32 %v473_v6 }
 0x1a6   :  { %v447_v42 = vrot.slane %v446_v41, 1  ;;  %v453_v16 = vmax.f32 %v451_v5, %v452_v13  ;;  %v466_v20 = vsub.f32 %v2196_v50, %v434_v49  ;;  %v475_v11 = vmul.f32 1.442695, %v465_v8 }
 0x1a7   :  { %v253_v22 = vadd.f32 %v252_v40, %v251_v48  ;;  %1865 = vrcp.f32 %v246_v31  ;;  %v441_v26 = vmax.f32 %v439_v45, %v440_v14  ;;  %v460_v30 = vmax.f32 %v458_v46, %v459_v9 }
 0x1a8   :  { %v448_v32 = vmax.f32 %v446_v41, %v447_v42  ;;  %v454_v43 = vrot.slane %v453_v16, 1  ;;  %1867 = vpow2.f32 %v475_v11  ;;  %v477_v17 = vmul.f32 1.442695, %v466_v20 }
 0x1a9   :  { %v2280_v51 = vpop.eup %1861  ;;  %v2283_v52 = vmul.f32 %v1860_v39, %v2210_v18  ;;  %v461_v53 = vrot.slane %v460_v30, 1  ;;  %v467_v54 = vsub.f32 %v2212_v36, %v441_v26  ;;  %v272_v56 = vadd.f32 %v271_v25, %v2250_v12 }
 0x1aa   :  { %v455_v50 = vmax.f32 %v453_v16, %v454_v43  ;;  %v468_v48 = vsub.f32 %v2214_v15, %v448_v32  ;;  %1869 = vpow2.f32 %v477_v17  ;;  %v487_v31 = vsel %vm88_vm2, %v2280_v51, 0.0 }
 0x1ab   :  { %v2290_v40 = vpop.eup %1863  ;;  %v462_v57 = vmax.f32 %v460_v30, %v461_v53  ;;  %v479_v58 = vmul.f32 1.442695, %v467_v54  ;;  %v488_v59 = vrot.slane %v487_v31, 4  ;;  %v260_v18 = vadd.f32 %v259_v34, %v2264_v23 }
 0x1ac   :  { %v469_v37 = vsub.f32 %v2222_v21, %v455_v50  ;;  %v481_v33 = vmul.f32 1.442695, %v468_v48  ;;  %v494_v36 = vsel %vm88_vm2, %v2290_v40, 0.0  ;;  %v277_v15 = vadd.f32 %v276_v35, %v2248_v44 }
 0x1ad   :  { %v1866_v12 = vpop.eup %1865  ;;  %1871 = vpow2.f32 %v479_v58  ;;  %v489_v25 = vadd.f32 %v488_v59, %v487_v31  ;;  %v495_v61 = vrot.slane %v494_v36, 4  ;;  %v266_v62 = vrot.slane %v2276_v47, 1 }
 0x1ae   :  { %v2300_v63 = vpop.eup %1867  ;;  %1873 = vpow2.f32 %v481_v33  ;;  %v483_v23 = vmul.f32 1.442695, %v469_v37  ;;  %v273_v0 = vrot.slane %v272_v56, 1  ;;  %v278_v21 = vrot.slane %v277_v15, 2 }
 0x1af   :  { %v470_v1 = vsub.f32 %v2228_v27, %v462_v57  ;;  %v490_v2 = vrot.slane %v489_v25, 2  ;;  %v496_v3 = vadd.f32 %v495_v61, %v494_v36  ;;  %v501_v4 = vsel %vm88_vm2, %v2300_v63, 0.0 }
 0x1b0   :  { %v2305_v44 = vpop.eup %1869  ;;  %1875 = vpow2.f32 %v483_v23  ;;  %v502_v35 = vrot.slane %v501_v4, 4  ;;  %v279_v5 = vadd.f32 %v278_v21, %v277_v15  ;;  %v282_v8 = vsel %vm88_vm2, %v2272_v28, 0.0  ;;  %v2331_v15 = vpop.permute.xlu1 %305 }
 0x1b1   :  { %v491_v45 = vadd.f32 %v490_v2, %v489_v25  ;;  %v497_v46 = vrot.slane %v496_v3, 2  ;;  %v508_v6 = vsel %vm88_vm2, %v2305_v44, 0.0  ;;  %v283_v39 = vrot.slane %v282_v8, 4 }
 0x1b2   :  { %v503_v27 = vadd.f32 %v502_v35, %v501_v4  ;;  %v509_v49 = vrot.slane %v508_v6, 4  ;;  %v280_v41 = vrot.slane %v279_v5, 1  ;;  %1877 = vrcp.f32 %v253_v22 }
 0x1b3   :  { %v2311_v13 = vpop.eup %1871  ;;  %v492_v34 = vrot.slane %v491_v45, 1  ;;  %v498_v14 = vadd.f32 %v497_v46, %v496_v3  ;;  %v284_v9 = vadd.f32 %v283_v39, %v282_v8  ;;  %1879 = vrcp.f32 %v260_v18 }
 0x1b4   :  { %v2313_v42 = vpop.eup %1873  ;;  %v298_v16 = vmul.f32 %v1866_v12, %v2218_v19  ;;  %v504_v20 = vrot.slane %v503_v27, 2  ;;  %v510_v11 = vadd.f32 %v509_v49, %v508_v6  ;;  %v515_v26 = vsel %vm88_vm2, %v2311_v13, 0.0 }
 0x1b5   :  { %v493_v30 = vadd.f32 %v492_v34, %v491_v45  ;;  %v499_v32 = vrot.slane %v498_v14, 1  ;;  %v516_v43 = vrot.slane %v515_v26, 4  ;;  %v522_v22 = vsel %vm88_vm2, %v2313_v42, 0.0 }
 0x1b6   :  { %v2320_v17 = vpop.eup %1875  ;;  %v2322_v53 = vadd.f32 %v504_v20, %v503_v27  ;;  %v511_v54 = vrot.slane %v510_v11, 2  ;;  %v267_v50 = vadd.f32 %v266_v62, %v2276_v47  ;;  %v285_v48 = vrot.slane %v284_v9, 2 }
 0x1b7   :  { %v485_v19 = vmul.f32 1.442695, %v470_v1  ;;  %v523_v31 = vrot.slane %v522_v22, 4  ;;  %v274_v57 = vadd.f32 %v273_v0, %v272_v56  ;;  %v281_v58 = vadd.f32 %v280_v41, %v279_v5 }
 0x1b8   :  { %v1878_v59 = vpop.eup %1877  ;;  %v500_v18 = vadd.f32 %v499_v32, %v498_v14  ;;  %v2325_v37 = vadd.f32 %v516_v43, %v515_v26  ;;  %v2329_v33 = vsel %vm88_vm2, %v2320_v17, 0.0  ;;  %1881 = vrcp.f32 %v493_v30 }
 0x1b9   :  { %v1880_v36 = vpop.eup %1879  ;;  %v506_v12 = vrot.slane %v2322_v53, 1  ;;  %v2334_v47 = vadd.f32 %v511_v54, %v510_v11  ;;  %v286_v25 = vadd.f32 %v285_v48, %v284_v9  ;;  %v299_v56 = vmul.f32 %v1878_v59, %v2224_v24 }
 0x1ba   :  { %1883 = vrcp.f32 %v267_v50  ;;  %v300_v61 = vmul.f32 %v1880_v36, %v2230_v29  ;;  %v308_v62 = vmul.f32 %v2331_v15, %v2283_v52  ;;  %v309_v23 = vmul.f32 %v2331_v15, %v298_v16 }
 0x1bb   :  { %v2341_v0 = vadd.f32 %v523_v31, %v522_v22  ;;  %v287_v21 = vrot.slane %v286_v25, 1  ;;  %1885 = vrcp.f32 %v274_v57  ;;  %v310_v1 = vmul.f32 %v2331_v15, %v299_v56 }
 0x1bc   :  { %1887 = vrcp.f32 %v281_v58  ;;  %v311_v2 = vmul.f32 %v2331_v15, %v300_v61  ;;  %v316_v3 = vsel %vm88_vm2, %v308_v62, 0.0  ;;  %v323_v24 = vsel %vm88_vm2, %v309_v23, 0.0 }
 0x1bd   :  { %v288_v4 = vadd.f32 %v287_v21, %v286_v25  ;;  %v317_v29 = vrot.slane %v316_v3, 4  ;;  %v324_v35 = vrot.slane %v323_v24, 4  ;;  %v330_v52 = vsel %vm88_vm2, %v310_v1, 0.0 }
 0x1be   :  { %v2348_v5 = vpop.eup %1881  ;;  %v518_v8 = vrot.slane %v2325_v37, 2  ;;  %v530_v45 = vrot.slane %v2329_v33, 4  ;;  %v331_v46 = vrot.slane %v330_v52, 4  ;;  %v337_v6 = vsel %vm88_vm2, %v311_v2, 0.0 }
 0x1bf   :  { %1889 = vrcp.f32 %v288_v4  ;;  %v318_v39 = vadd.f32 %v317_v29, %v316_v3  ;;  %v325_v27 = vadd.f32 %v324_v35, %v323_v24  ;;  %v338_v49 = vrot.slane %v337_v6, 4 }
 0x1c0   :  { %v1884_v41 = vpop.eup %1883  ;;  %1891 = vrcp.f32 %v500_v18  ;;  %v332_v34 = vadd.f32 %v331_v46, %v330_v52  ;;  %v513_v35 = vrot.slane %v2334_v47, 1 }
 0x1c1   :  { %v1886_v14 = vpop.eup %1885  ;;  %v301_v9 = vmul.f32 %v1884_v41, %v2234_v38  ;;  %v319_v16 = vrot.slane %v318_v39, 2  ;;  %v326_v20 = vrot.slane %v325_v27, 2  ;;  %v339_v11 = vadd.f32 %v338_v49, %v337_v6 }
 0x1c2   :  { %v1888_v26 = vpop.eup %1887  ;;  %v302_v30 = vmul.f32 %v1886_v14, %v2238_v55  ;;  %v333_v32 = vrot.slane %v332_v34, 2  ;;  %1893 = vpow2.f32 %v485_v19  ;;  %v2359_v38 = vadd.f32 %v506_v12, %v2322_v53 }
 0x1c3   :  { %v303_v43 = vmul.f32 %v1888_v26, %v2242_v60  ;;  %v312_v22 = vmul.f32 %v2331_v15, %v301_v9  ;;  %v320_v54 = vadd.f32 %v319_v16, %v318_v39  ;;  %v327_v50 = vadd.f32 %v326_v20, %v325_v27 }
 0x1c4   :  { %v313_v48 = vmul.f32 %v2331_v15, %v302_v30  ;;  %v334_v31 = vadd.f32 %v333_v32, %v332_v34  ;;  %v340_v57 = vrot.slane %v339_v11, 2  ;;  %v519_v9 = vadd.f32 %v518_v8, %v2325_v37 }
 0x1c5   :  { %v1890_v58 = vpop.eup %1889  ;;  %v314_v59 = vmul.f32 %v2331_v15, %v303_v43  ;;  %v321_v55 = vrot.slane %v320_v54, 1  ;;  %v328_v18 = vrot.slane %v327_v50, 1  ;;  %v344_v19 = vsel %vm88_vm2, %v312_v22, 0.0 }
 0x1c6   :  { %v2363_v36 = vpop.eup %1891  ;;  %v304_v60 = vmul.f32 %v1890_v58, %v2272_v28  ;;  %v335_v25 = vrot.slane %v334_v31, 1  ;;  %v341_v56 = vadd.f32 %v340_v57, %v339_v11  ;;  %v345_v61 = vrot.slane %v344_v19, 4 }
 0x1c7   :  { %v322_v62 = vadd.f32 %v321_v55, %v320_v54  ;;  %v329_v23 = vadd.f32 %v328_v18, %v327_v50  ;;  %v351_v21 = vsel %vm88_vm2, %v313_v48, 0.0  ;;  %v358_v53 = vsel %vm88_vm2, %v314_v59, 0.0 }
 0x1c8   :  { %v2368_v12 = vpop.eup %1893  ;;  %v315_v1 = vmul.f32 %v2331_v15, %v304_v60  ;;  %v336_v2 = vadd.f32 %v335_v25, %v334_v31  ;;  %v342_v3 = vrot.slane %v341_v56, 1  ;;  %v346_v24 = vadd.f32 %v345_v61, %v344_v19 }
 0x1c9   :  { %v352_v4 = vrot.slane %v351_v21, 4  ;;  %v359_v29 = vrot.slane %v358_v53, 4  ;;  %v635_v28 = vsel %vm634_vm3, %v329_v23, %v322_v62  ;;  %v514_v15 = vadd.f32 %v513_v35, %v2334_v47 }
 0x1ca   :  { %v343_v52 = vadd.f32 %v342_v3, %v341_v56  ;;  %v347_v46 = vrot.slane %v346_v24, 2  ;;  %v365_v6 = vsel %vm88_vm2, %v315_v1, 0.0  ;;  %v637_v39 = vsel %vm636_vm4, %v336_v2, %v635_v28 }
 0x1cb   :  { %v353_v27 = vadd.f32 %v352_v4, %v351_v21  ;;  %v360_v49 = vadd.f32 %v359_v29, %v358_v53  ;;  %v366_v41 = vrot.slane %v365_v6, 4  ;;  %v525_v16 = vrot.slane %v2341_v0, 2  ;;  %v560_v53 = vpop.permute.xlu1 %559 }
 0x1cc   :  { %v348_v34 = vadd.f32 %v347_v46, %v346_v24  ;;  %v639_v14 = vsel %vm638_vm5, %v343_v52, %v637_v39  ;;  %v531_v30 = vadd.f32 %v530_v45, %v2329_v33  ;;  %v520_v43 = vrot.slane %v519_v9, 1 }
 0x1cd   :  { %v354_v20 = vrot.slane %v353_v27, 2  ;;  %v361_v11 = vrot.slane %v360_v49, 2  ;;  %v367_v26 = vadd.f32 %v366_v41, %v365_v6  ;;  %v526_v47 = vadd.f32 %v525_v16, %v2341_v0 }
 0x1ce   :  { %v349_v32 = vrot.slane %v348_v34, 1  ;;  %v536_v22 = vsel %vm88_vm2, %v2368_v12, 0.0  ;;  %v532_v37 = vrot.slane %v531_v30, 2  ;;  %v521_v31 = vadd.f32 %v520_v43, %v519_v9 }
 0x1cf   :  { %v355_v54 = vadd.f32 %v354_v20, %v353_v27  ;;  %v362_v50 = vadd.f32 %v361_v11, %v360_v49  ;;  %v368_v48 = vrot.slane %v367_v26, 2  ;;  %v527_v57 = vrot.slane %v526_v47, 1 }
 0x1d0   :  { %v350_v8 = vadd.f32 %v349_v32, %v348_v34  ;;  %v537_v58 = vrot.slane %v536_v22, 4  ;;  %v533_v19 = vadd.f32 %v532_v37, %v531_v30  ;;  %1895 = vrcp.f32 %v2359_v38 }
 0x1d1   :  { %v356_v59 = vrot.slane %v355_v54, 1  ;;  %v363_v55 = vrot.slane %v362_v50, 1  ;;  %v369_v18 = vadd.f32 %v368_v48, %v367_v26  ;;  %v528_v45 = vadd.f32 %v527_v57, %v526_v47 }
 0x1d2   :  { %v641_v33 = vsel %vm640_vm6, %v350_v8, %v639_v14  ;;  %v538_v60 = vadd.f32 %v537_v58, %v536_v22  ;;  %v534_v61 = vrot.slane %v533_v19, 1  ;;  %1897 = vrcp.f32 %v514_v15 }
 0x1d3   :  { %v357_v0 = vadd.f32 %v356_v59, %v355_v54  ;;  %v364_v25 = vadd.f32 %v363_v55, %v362_v50  ;;  %v370_v56 = vrot.slane %v369_v18, 1  ;;  %v551_v23 = vmul.f32 %v2348_v5, %v2280_v51 }
 0x1d4   :  { %v539_v62 = vrot.slane %v538_v60, 2  ;;  %v552_v21 = vmul.f32 %v2363_v36, %v2290_v40  ;;  %v535_v3 = vadd.f32 %v534_v61, %v533_v19  ;;  %1899 = vrcp.f32 %v521_v31 }
 0x1d5   :  { %v371_v1 = vadd.f32 %v370_v56, %v369_v18  ;;  %v643_v2 = vsel %vm642_vm7, %v357_v0, %v641_v33  ;;  %1901 = vrcp.f32 %v528_v45  ;;  %v562_v4 = vmul.f32 %v560_v53, %v551_v23 }
 0x1d6   :  { %v645_v38 = vsel %vm644_vm8, %v364_v25, %v643_v2  ;;  %v540_v24 = vadd.f32 %v539_v62, %v538_v60  ;;  %1903 = vrcp.f32 %v535_v3  ;;  %v563_v28 = vmul.f32 %v560_v53, %v552_v21  ;;  %v1896_v35 = vpop.eup %1895 }
 0x1d7   :  { %v647_v29 = vsel %vm646_vm9, %v371_v1, %v645_v38  ;;  %v570_v40 = vsel %vm88_vm2, %v562_v4, 0.0  ;;  %v553_v5 = vmul.f32 %v1896_v35, %v2300_v63 }
 0x1d8   :  { %1772 = vmatmul.msk.f32.vlgmr.msrb.gmra.mxu2 %vm88_vm2, %v647_v29  ;;  %v541_v51 = vrot.slane %v540_v24, 1  ;;  %v571_v36 = vrot.slane %v570_v40, 4  ;;  %v577_v52 = vsel %vm88_vm2, %v563_v28, 0.0  ;;  %v1898_v46 = vpop.eup %1897 }
 0x1d9   :  { %v578_v39 = vrot.slane %v577_v52, 4  ;;  %v554_v49 = vmul.f32 %v1898_v46, %v2305_v44  ;;  %v564_v41 = vmul.f32 %v560_v53, %v553_v5 }
 0x1da   :  { %v542_v6 = vadd.f32 %v541_v51, %v540_v24  ;;  %v1900_v27 = vpop.eup %1899  ;;  %v572_v15 = vadd.f32 %v571_v36, %v570_v40 }
 0x1db   :  { %v1902_v34 = vpop.eup %1901  ;;  %v555_v14 = vmul.f32 %v1900_v27, %v2311_v13  ;;  %v579_v9 = vadd.f32 %v578_v39, %v577_v52  ;;  %v565_v63 = vmul.f32 %v560_v53, %v554_v49  ;;  %v584_v26 = vsel %vm88_vm2, %v564_v41, 0.0 }
 0x1dc   :  { %1905 = vrcp.f32 %v542_v6  ;;  %v1904_v16 = vpop.eup %1903  ;;  %v556_v20 = vmul.f32 %v1902_v34, %v2313_v42  ;;  %v573_v11 = vrot.slane %v572_v15, 2  ;;  %v585_v47 = vrot.slane %v584_v26, 4 }
 0x1dd   :  { %v557_v30 = vmul.f32 %v1904_v16, %v2320_v17  ;;  %v566_v32 = vmul.f32 %v560_v53, %v555_v14  ;;  %v580_v43 = vrot.slane %v579_v9, 2  ;;  %v591_v54 = vsel %vm88_vm2, %v565_v63, 0.0 }
 0x1de   :  { %v567_v44 = vmul.f32 %v560_v53, %v556_v20  ;;  %v574_v22 = vadd.f32 %v573_v11, %v572_v15  ;;  %v586_v13 = vadd.f32 %v585_v47, %v584_v26  ;;  %v592_v37 = vrot.slane %v591_v54, 4 }
 0x1df   :  { %v568_v50 = vmul.f32 %v560_v53, %v557_v30  ;;  %v581_v48 = vadd.f32 %v580_v43, %v579_v9  ;;  %v598_v42 = vsel %vm88_vm2, %v566_v32, 0.0  ;;  %v1827_v30 = vld [vmem:[%s2887_s3 + $0x71] ss:$0 sm:$0xff] }
 0x1e0   :  { %v575_v8 = vrot.slane %v574_v22, 1  ;;  %v605_v31 = vsel %vm88_vm2, %v567_v44, 0.0  ;;  %v587_v59 = vrot.slane %v586_v13, 2  ;;  %v593_v17 = vadd.f32 %v592_v37, %v591_v54 }
 0x1e1   :  { %v582_v58 = vrot.slane %v581_v48, 1  ;;  %v599_v55 = vrot.slane %v598_v42, 4  ;;  %v606_v33 = vrot.slane %v605_v31, 4  ;;  %v612_v45 = vsel %vm88_vm2, %v568_v50, 0.0 }
 0x1e2   :  { %v1906_v57 = vpop.eup %1905  ;;  %v576_v19 = vadd.f32 %v575_v8, %v574_v22  ;;  %v588_v0 = vadd.f32 %v587_v59, %v586_v13  ;;  %v594_v25 = vrot.slane %v593_v17, 2  ;;  %v613_v23 = vrot.slane %v612_v45, 4 }
 0x1e3   :  { %v558_v18 = vmul.f32 %v1906_v57, %v2368_v12  ;;  %v583_v60 = vadd.f32 %v582_v58, %v581_v48  ;;  %v600_v56 = vadd.f32 %v599_v55, %v598_v42  ;;  %v607_v62 = vadd.f32 %v606_v33, %v605_v31 }
 0x1e4   :  { %v589_v21 = vrot.slane %v588_v0, 1  ;;  %v595_v1 = vadd.f32 %v594_v25, %v593_v17  ;;  %v614_v38 = vadd.f32 %v613_v23, %v612_v45  ;;  %v2041_v13 = vmov 16.0  }
 0x1e5   :  { %v569_v61 = vmul.f32 %v560_v53, %v558_v18  ;;  %v601_v2 = vrot.slane %v600_v56, 2  ;;  %v608_v3 = vrot.slane %v607_v62, 2  ;;  %v656_v12 = vsel %vm634_vm3, %v583_v60, %v576_v19 }
 0x1e6   :  { %v590_v4 = vadd.f32 %v589_v21, %v588_v0  ;;  %v596_v29 = vrot.slane %v595_v1, 1  ;;  %v615_v40 = vrot.slane %v614_v38, 2  ;;  %1907 = vrcp.f32 %v2041_v13 }
 0x1e7   :  { %v619_v24 = vsel %vm88_vm2, %v569_v61, 0.0  ;;  %v602_v28 = vadd.f32 %v601_v2, %v600_v56  ;;  %v609_v51 = vadd.f32 %v608_v3, %v607_v62  ;;  %v70_v56 = vld [vmem:[%s2887_s3 + $0x28] sm:$0xff]  ;;  %v69_v61 = vld [vmem:[%s2887_s3 + $0x20] sm:$0xff] }
 0x1e8   :  { %v620_v35 = vrot.slane %v619_v24, 4  ;;  %v597_v5 = vadd.f32 %v596_v29, %v595_v1  ;;  %v657_v52 = vsel %vm636_vm4, %v590_v4, %v656_v12  ;;  %v616_v6 = vadd.f32 %v615_v40, %v614_v38  ;;  %777 = vmatpush.msra.mxu3 %v70_v56 }
 0x1e9   :  { %v603_v36 = vrot.slane %v602_v28, 1  ;;  %v610_v46 = vrot.slane %v609_v51, 1 }
 0x1ea   :  { %v621_v53 = vadd.f32 %v620_v35, %v619_v24  ;;  %v658_v49 = vsel %vm638_vm5, %v597_v5, %v657_v52  ;;  %v617_v15 = vrot.slane %v616_v6, 1  ;;  %778 = vmatpush.msra.mxu3 %v69_v61  ;;  %v1829_v5 = vld [vmem:[%s2887_s3 + $0x75] ss:$0 sm:$0xff] }
 0x1eb   :  { %v604_v39 = vadd.f32 %v603_v36, %v602_v28  ;;  %v611_v41 = vadd.f32 %v610_v46, %v609_v51  ;;  %v1828_v28 = vld [vmem:[%s2887_s3 + $0x74] ss:$0 sm:$0xff] }
 0x1ec   :  { %v622_v27 = vrot.slane %v621_v53, 2  ;;  %v618_v9 = vadd.f32 %v617_v15, %v616_v6  ;;  %v1908_v37 = vpop.eup %1907 }
 0x1ed   :  { %v659_v14 = vsel %vm640_vm6, %v604_v39, %v658_v49  ;;  %v700_v8 = vmul.f32 16.0, %v1908_v37  ;;  %vm704_vm10 = vweird.f32 %v1908_v37 }
 0x1ee   :  { %v623_v34 = vadd.f32 %v622_v27, %v621_v53  ;;  %v660_v16 = vsel %vm642_vm7, %v611_v41, %v659_v14 }
 0x1ef   :  { %v661_v63 = vsel %vm644_vm8, %v618_v9, %v660_v16  ;;  %v701_v42 = vsub.f32 1.0, %v700_v8 }
 0x1f0   :  { %v624_v20 = vrot.slane %v623_v34, 1 }
 0x1f1   :  { %v702_v31 = vmul.f32 %v1908_v37, %v701_v42  ;;  %v71_v42 = vld [vmem:[%s2887_s3 + $0x30] sm:$0xff] }
 0x1f2   :  { %v625_v11 = vadd.f32 %v624_v20, %v623_v34 }
 0x1f3   :  { %v703_v57 = vadd.f32 %v1908_v37, %v702_v31 }
 0x1f4   :  { %v662_v26 = vsel %vm646_vm9, %v625_v11, %v661_v63 }
 0x1f5   :  { %1773 = vmatmul.msk.f32.gmra.mxu2 %vm88_vm2, %v662_v26  ;;  %v2426_v58 = vsel %vm704_vm10, %v1908_v37, %v703_v57  ;;  %v72_v37 = vld [vmem:[%s2887_s3 + $0x38] sm:$0xff] }
 0x25b   :  { %v685_v32 = vpop.f32.mrf.mxu2 }
 0x25c   :  { %v686_v43 = vadd.f32 %v1827_v30, %v685_v32  ;;  %v77_v32 = vld [vmem:[%s2887_s3 + $0x60] sm:$0xff] }
 0x25e   :  { %v691_v47 = vadd.f32 %v686_v43, %v2105_v7  ;;  %v76_v43 = vld [vmem:[%s2887_s3 + $0x58] sm:$0xff] }
 0x260   :  { %v693_v44 = vsel %vm88_vm2, %v691_v47, 0.0 }
 0x261   :  { %694 = vadd.xlane.f32.xlu2 %v693_v44 }
 0x278   :  { %v688_v22 = vpop.f32.mrf.mxu2 }
 0x279   :  { %v689_v54 = vadd.f32 %v1827_v30, %v688_v22  ;;  %v78_v30 = vld [vmem:[%s2887_s3 + $0x68] sm:$0xff]  ;;  %v75_v22 = vld [vmem:[%s2887_s3 + $0x50] sm:$0xff] }
 0x27a   :  { %820 = vmatpush.msrb.mxu0 %v78_v30 }
 0x27b   :  { %v692_v50 = vadd.f32 %v689_v54, %v2112_v10  ;;  %v74_v54 = vld [vmem:[%s2887_s3 + $0x48] sm:$0xff] }
 0x27c   :  { %821 = vmatpush.msrb.mxu0 %v77_v32 }
 0x27d   :  { %v696_v48 = vsel %vm88_vm2, %v692_v50, 0.0 }
 0x27e   :  { %697 = vadd.xlane.f32.xlu2 %v696_v48  ;;  %822 = vmatpush.msrb.mxu0 %v76_v43  ;;  %v73_v48 = vld [vmem:[%s2887_s3 + $0x40] sm:$0xff]  ;;  %v1832_v43 = vld [vmem:[%s2887_s3 + $0x76] ss:$0 sm:$0xff] }
 0x280   :  { %823 = vmatpush.msrb.mxu0 %v75_v22 }
 0x282   :  { %824 = vmatpush.msrb.mxu0 %v74_v54  ;;  %v1833_v54 = vld [vmem:[%s2887_s3 + $0x77] ss:$0 sm:$0xff] }
 0x284   :  { %825 = vmatpush.msrb.mxu0 %v73_v48 }
 0x286   :  { %826 = vmatpush.msrb.mxu0 %v72_v37 }
 0x288   :  { %827 = vmatpush.msrb.mxu0 %v71_v42 }
 0x2d4   :  { %v695_v7 = vpop.xlane.xlu2 %694 }
 0x2d5   :  { %v706_v59 = vmul.f32 %v2426_v58, %v695_v7 }
 0x2d7   :  { %v708_v17 = vsub.f32 %v691_v47, %v706_v59  ;;  %v1830_v47 = vld [vmem:[%s2887_s3 + $0x72] ss:$0 sm:$0xff] }
 0x2d9   :  { %v710_v55 = vmul.f32 %v708_v17, %v708_v17  ;;  %v749_v40 = vmul.f32 %v1828_v28, %v708_v17 }
 0x2db   :  { %v712_v10 = vsel %vm88_vm2, %v710_v55, 0.0 }
 0x2dc   :  { %713 = vadd.xlane.f32.xlu0 %v712_v10 }
 0x2f1   :  { %v698_v18 = vpop.xlane.xlu2 %697 }
 0x2f2   :  { %v707_v19 = vmul.f32 %v2426_v58, %v698_v18 }
 0x2f4   :  { %v709_v33 = vsub.f32 %v692_v50, %v707_v19 }
 0x2f6   :  { %v711_v45 = vmul.f32 %v709_v33, %v709_v33  ;;  %v750_v20 = vmul.f32 %v1828_v28, %v709_v33 }
 0x2f8   :  { %v715_v60 = vsel %vm88_vm2, %v711_v45, 0.0 }
 0x2f9   :  { %716 = vadd.xlane.f32.xlu1 %v715_v60 }
 0x34f   :  { %v714_v0 = vpop.xlane.xlu0 %713 }
 0x350   :  { %v718_v25 = vmul.f32 0.06666667, %v714_v0 }
 0x352   :  { %1909 = vrsqrt.f32 %v718_v25  ;;  %vm727_vm11 = vcmp.eq.f32.partialorder %v718_v25, inf  ;;  %v730_v24 = vand.u32 2147483648, %v718_v25  ;;  %vm729_vm12 = vcmp.eq.f32.partialorder %v718_v25, 0.0 }
 0x358   :  { %v1910_v62 = vpop.eup %1909 }
 0x359   :  { %v721_v23 = vmul.f32 %v1910_v62, %v718_v25 }
 0x35b   :  { %v722_v21 = vmul.f32 %v1910_v62, %v721_v23 }
 0x35d   :  { %v723_v1 = vmul.f32 0.5, %v722_v21  ;;  %v1831_v21 = vld [vmem:[%s2887_s3 + $0x73] ss:$0 sm:$0xff] }
 0x35f   :  { %v724_v2 = vsub.f32 1.5, %v723_v1 }
 0x361   :  { %v725_v3 = vmul.f32 %v1910_v62, %v724_v2 }
 0x363   :  { %v726_v38 = vmul.f32 %v725_v3, %v718_v25 }
 0x365   :  { %v728_v12 = vsel %vm727_vm11, %v718_v25, %v726_v38 }
 0x366   :  { %v731_v4 = vsel %vm729_vm12, %v730_v24, %v728_v12 }
 0x367   :  { %v744_v29 = vadd.f32 1e-06, %v731_v4 }
 0x369   :  { %1911 = vrcp.f32 %v744_v29 }
 0x36c   :  { %v717_v35 = vpop.xlane.xlu1 %716 }
 0x36d   :  { %v719_v51 = vmul.f32 0.06666667, %v717_v35 }
 0x36f   :  { %v1912_v36 = vpop.eup %1911  ;;  %1913 = vrsqrt.f32 %v719_v51  ;;  %vm739_vm13 = vcmp.eq.f32.partialorder %v719_v51, inf  ;;  %v742_v34 = vand.u32 2147483648, %v719_v51  ;;  %vm741_vm14 = vcmp.eq.f32.partialorder %v719_v51, 0.0 }
 0x370   :  { %v751_v53 = vmul.f32 %v1912_v36, %v749_v40 }
 0x372   :  { %v2444_v52 = vadd.f32 %v1829_v5, %v751_v53 }
 0x374   :  { %1774 = vmatmul.msk.f32.vlgmr.msra.gmra.mxu3 %vm88_vm2, %v2444_v52 }
 0x375   :  { %v1914_v46 = vpop.eup %1913 }
 0x376   :  { %v733_v6 = vmul.f32 %v1914_v46, %v719_v51 }
 0x378   :  { %v734_v39 = vmul.f32 %v1914_v46, %v733_v6 }
 0x37a   :  { %v735_v27 = vmul.f32 0.5, %v734_v39 }
 0x37c   :  { %v736_v49 = vsub.f32 1.5, %v735_v27 }
 0x37e   :  { %v737_v41 = vmul.f32 %v1914_v46, %v736_v49  ;;  %v1779_v49 = vld [vmem:[%s2887_s3 + $0x80] sm:$0xff] }
 0x37f   :  { %937 = vmatpush.msrb.mxu1 %v1779_v49 }
 0x380   :  { %v738_v15 = vmul.f32 %v737_v41, %v719_v51  ;;  %v1778_v41 = vld [vmem:[%s2887_s3 + $0x78] sm:$0xff] }
 0x381   :  { %938 = vmatpush.msrb.mxu1 %v1778_v41 }
 0x382   :  { %v740_v14 = vsel %vm739_vm13, %v719_v51, %v738_v15 }
 0x383   :  { %v743_v9 = vsel %vm741_vm14, %v742_v34, %v740_v14 }
 0x384   :  { %v745_v16 = vadd.f32 1e-06, %v743_v9 }
 0x386   :  { %1915 = vrcp.f32 %v745_v16 }
 0x38c   :  { %v1916_v63 = vpop.eup %1915 }
 0x38d   :  { %v752_v11 = vmul.f32 %v1916_v63, %v750_v20 }
 0x38f   :  { %v755_v26 = vadd.f32 %v1829_v5, %v752_v11 }
 0x391   :  { %1775 = vmatmul.msk.f32.gmra.mxu3 %vm88_vm2, %v755_v26 }
 0x3f7   :  { %v780_v44 = vpop.f32.mrf.mxu3 }
 0x3f8   :  { %v781_v50 = vadd.f32 %v1830_v47, %v780_v44 }
 0x3fa   :  { %v788_v13 = vmul.f32 0.044715, %v781_v50  ;;  %v786_v17 = vmul.f32 0.5, %v781_v50 }
 0x3fc   :  { %v790_v8 = vmul.f32 %v788_v13, %v781_v50 }
 0x3fe   :  { %v792_v31 = vmul.f32 %v790_v8, %v781_v50 }
 0x400   :  { %v794_v57 = vadd.f32 %v792_v31, %v781_v50 }
 0x402   :  { %v796_v7 = vmul.f32 0.7978846, %v794_v57 }
 0x404   :  { %1917 = vtanh.f32 %v796_v7 }
 0x40a   :  { %v1918_v59 = vpop.eup %1917 }
 0x40b   :  { %v800_v55 = vadd.f32 1.0, %v1918_v59 }
 0x40d   :  { %v802_v10 = vmul.f32 %v800_v55, %v786_v17 }
 0x40f   :  { %1776 = vmatmul.msk.f32.vlgmr.msrb.gmra.mxu0 %vm805_vm15, %v802_v10 }
 0x414   :  { %v783_v18 = vpop.f32.mrf.mxu3 }
 0x415   :  { %v784_v19 = vadd.f32 %v1830_v47, %v783_v18 }
 0x417   :  { %v789_v33 = vmul.f32 0.044715, %v784_v19  ;;  %v787_v61 = vmul.f32 0.5, %v784_v19 }
 0x419   :  { %v791_v45 = vmul.f32 %v789_v33, %v784_v19 }
 0x41b   :  { %v793_v60 = vmul.f32 %v791_v45, %v784_v19 }
 0x41d   :  { %v795_v0 = vadd.f32 %v793_v60, %v784_v19 }
 0x41f   :  { %v797_v25 = vmul.f32 0.7978846, %v795_v0  ;;  %v1834_v0 = vld [vmem:[%s2887_s3 + $0xe8] ss:$0 sm:$0xff] }
 0x421   :  { %1919 = vtanh.f32 %v797_v25 }
 0x427   :  { %v1920_v56 = vpop.eup %1919 }
 0x428   :  { %v801_v62 = vadd.f32 1.0, %v1920_v56 }
 0x42a   :  { %v803_v23 = vmul.f32 %v801_v62, %v787_v61 }
 0x42c   :  { %1777 = vmatmul.msk.f32.gmra.mxu0 %vm805_vm15, %v803_v23 }
 0x48c   :  { %v829_v1 = vpop.f32.mrf.mxu0 }
 0x48d   :  { %v830_v2 = vadd.f32 %v1831_v21, %v829_v1 }
 0x48f   :  { %v835_v3 = vadd.f32 %v830_v2, %v2444_v52 }
 0x491   :  { %v837_v38 = vsel %vm88_vm2, %v835_v3, 0.0 }
 0x492   :  { %838 = vadd.xlane.f32.xlu2 %v837_v38 }
 0x4a9   :  { %v832_v24 = vpop.f32.mrf.mxu0 }
 0x4aa   :  { %v833_v12 = vadd.f32 %v1831_v21, %v832_v24 }
 0x4ac   :  { %v836_v4 = vadd.f32 %v833_v12, %v755_v26 }
 0x4ae   :  { %v840_v29 = vsel %vm88_vm2, %v836_v4, 0.0 }
 0x4af   :  { %841 = vadd.xlane.f32.xlu2 %v840_v29 }
 0x505   :  { %v839_v28 = vpop.xlane.xlu2 %838 }
 0x506   :  { %v843_v35 = vmul.f32 %v839_v28, %v2426_v58 }
 0x508   :  { %v845_v51 = vsub.f32 %v835_v3, %v843_v35 }
 0x50a   :  { %v847_v40 = vmul.f32 %v845_v51, %v845_v51  ;;  %v886_v22 = vmul.f32 %v1832_v43, %v845_v51 }
 0x50c   :  { %v849_v5 = vsel %vm88_vm2, %v847_v40, 0.0 }
 0x50d   :  { %850 = vadd.xlane.f32.xlu2 %v849_v5 }
 0x522   :  { %v842_v36 = vpop.xlane.xlu2 %841 }
 0x523   :  { %v844_v53 = vmul.f32 %v842_v36, %v2426_v58 }
 0x525   :  { %v846_v52 = vsub.f32 %v836_v4, %v844_v53 }
 0x527   :  { %v848_v46 = vmul.f32 %v846_v52, %v846_v52  ;;  %v887_v19 = vmul.f32 %v1832_v43, %v846_v52 }
 0x529   :  { %v852_v6 = vsel %vm88_vm2, %v848_v46, 0.0 }
 0x52a   :  { %853 = vadd.xlane.f32.xlu2 %v852_v6 }
 0x580   :  { %v851_v39 = vpop.xlane.xlu2 %850 }
 0x581   :  { %v855_v27 = vmul.f32 0.06666667, %v851_v39 }
 0x583   :  { %1921 = vrsqrt.f32 %v855_v27  ;;  %vm864_vm0 = vcmp.eq.f32.partialorder %v855_v27, inf  ;;  %v867_v11 = vand.u32 2147483648, %v855_v27  ;;  %vm866_vm10 = vcmp.eq.f32.partialorder %v855_v27, 0.0 }
 0x589   :  { %v1922_v15 = vpop.eup %1921 }
 0x58a   :  { %v858_v34 = vmul.f32 %v1922_v15, %v855_v27 }
 0x58c   :  { %v859_v14 = vmul.f32 %v1922_v15, %v858_v34 }
 0x58e   :  { %v860_v9 = vmul.f32 0.5, %v859_v14 }
 0x590   :  { %v861_v16 = vsub.f32 1.5, %v860_v9 }
 0x592   :  { %v862_v20 = vmul.f32 %v1922_v15, %v861_v16 }
 0x594   :  { %v863_v63 = vmul.f32 %v862_v20, %v855_v27 }
 0x596   :  { %v865_v26 = vsel %vm864_vm0, %v855_v27, %v863_v63 }
 0x597   :  { %v868_v30 = vsel %vm866_vm10, %v867_v11, %v865_v26 }
 0x598   :  { %v881_v32 = vadd.f32 1e-06, %v868_v30 }
 0x59a   :  { %1923 = vrcp.f32 %v881_v32 }
 0x59d   :  { %v854_v47 = vpop.xlane.xlu2 %853 }
 0x59e   :  { %v856_v44 = vmul.f32 0.06666667, %v854_v47 }
 0x5a0   :  { %v1924_v50 = vpop.eup %1923  ;;  %1925 = vrsqrt.f32 %v856_v44  ;;  %vm876_vm11 = vcmp.eq.f32.partialorder %v856_v44, inf  ;;  %v879_v17 = vand.u32 2147483648, %v856_v44  ;;  %vm878_vm12 = vcmp.eq.f32.partialorder %v856_v44, 0.0 }
 0x5a1   :  { %v888_v48 = vmul.f32 %v1924_v50, %v886_v22 }
 0x5a3   :  { %v2500_v13 = vadd.f32 %v1833_v54, %v888_v48 }
 0x5a5   :  { %1800 = vmatmul.msk.f32.vlgmr.msrb.gmra.mxu1 %vm88_vm2, %v2500_v13 }
 0x5a6   :  { %v1926_v37 = vpop.eup %1925 }
 0x5a7   :  { %v870_v8 = vmul.f32 %v1926_v37, %v856_v44 }
 0x5a9   :  { %v871_v42 = vmul.f32 %v1926_v37, %v870_v8 }
 0x5ab   :  { %v872_v31 = vmul.f32 0.5, %v871_v42 }
 0x5ad   :  { %v873_v57 = vsub.f32 1.5, %v872_v31 }
 0x5af   :  { %v874_v7 = vmul.f32 %v1926_v37, %v873_v57 }
 0x5b1   :  { %v875_v59 = vmul.f32 %v874_v7, %v856_v44 }
 0x5b3   :  { %v877_v55 = vsel %vm876_vm11, %v856_v44, %v875_v59 }
 0x5b4   :  { %v880_v10 = vsel %vm878_vm12, %v879_v17, %v877_v55 }
 0x5b5   :  { %v882_v18 = vadd.f32 1e-06, %v880_v10 }
 0x5b7   :  { %1927 = vrcp.f32 %v882_v18 }
 0x5bd   :  { %v1928_v33 = vpop.eup %1927 }
 0x5be   :  { %v889_v45 = vmul.f32 %v1928_v33, %v887_v19 }
 0x5c0   :  { %v2504_v60 = vadd.f32 %v1833_v54, %v889_v45 }
 0x5c2   :  { %1801 = vmatmul.msk.f32.gmra.mxu1 %vm88_vm2, %v2504_v60 }
 0x622   :  { %v940_v25 = vpop.f32.mrf.mxu1 }
 0x623   :  { %v941_v56 = vadd.f32 %v1834_v0, %v940_v25 }
 0x625   :  { %1133 = vrot.lane.b32.xlu1 %v941_v56, %s2039_s15  ;;  %970 = vrot.lane.b32.xlu2 %v941_v56, %s2040_s16  ;;  %v947_v23 = vrot.slane %v941_v56, 1  ;;  %v948_v21 = vrot.slane %v941_v56, 2  ;;  %v949_v1 = vrot.slane %v941_v56, 3  ;;  %v950_v2 = vrot.slane %v941_v56, 4 }
 0x626   :  { %v951_v3 = vrot.slane %v941_v56, 5  ;;  %v952_v38 = vrot.slane %v941_v56, 6  ;;  %v953_v24 = vrot.slane %v941_v56, 7  ;;  %v954_v12 = vperm.slane %v941_v56, 0 }
 0x627   :  { %v955_v4 = vperm.slane %v947_v23, 0  ;;  %v956_v29 = vperm.slane %v948_v21, 0  ;;  %v957_v28 = vperm.slane %v949_v1, 0  ;;  %v958_v35 = vperm.slane %v950_v2, 0 }
 0x628   :  { %v959_v51 = vperm.slane %v951_v3, 0  ;;  %v960_v40 = vperm.slane %v952_v38, 0  ;;  %v961_v5 = vperm.slane %v953_v24, 0 }
 0x63f   :  { %v943_v61 = vpop.f32.mrf.mxu1 }
 0x640   :  { %v2513_v62 = vadd.f32 %v1834_v0, %v943_v61 }
 0x642   :  { %1387 = vrot.lane.b32.xlu2 %v2513_v62, %s2039_s15  ;;  %1224 = vrot.lane.b32.xlu0 %v2513_v62, %s2040_s16 }
 0x67f   :  { %v971_v36 = vpop.permute.xlu2 %970 }
 0x680   :  { %v2519_v53 = vmul.f32 %v971_v36, %v954_v12  ;;  %v2521_v52 = vmul.f32 %v971_v36, %v955_v4  ;;  %v2523_v46 = vmul.f32 %v971_v36, %v956_v29  ;;  %v2525_v6 = vmul.f32 %v971_v36, %v957_v28 }
 0x681   :  { %v2527_v39 = vmul.f32 %v971_v36, %v958_v35  ;;  %v2529_v27 = vmul.f32 %v971_v36, %v959_v51  ;;  %v2531_v49 = vmul.f32 %v971_v36, %v960_v40  ;;  %v2533_v41 = vmul.f32 %v971_v36, %v961_v5 }
 0x682   :  { %v981_v15 = vsel %vm88_vm2, %v2519_v53, -inf  ;;  %v988_v34 = vsel %vm88_vm2, %v2521_v52, -inf  ;;  %v995_v14 = vsel %vm88_vm2, %v2523_v46, -inf  ;;  %v1002_v9 = vsel %vm88_vm2, %v2525_v6, -inf }
 0x683   :  { %v982_v16 = vrot.slane %v981_v15, 4  ;;  %v989_v20 = vrot.slane %v988_v34, 4  ;;  %v996_v63 = vrot.slane %v995_v14, 4  ;;  %v1003_v11 = vrot.slane %v1002_v9, 4 }
 0x684   :  { %v1009_v26 = vsel %vm88_vm2, %v2527_v39, -inf  ;;  %v1016_v30 = vsel %vm88_vm2, %v2529_v27, -inf  ;;  %v1023_v32 = vsel %vm88_vm2, %v2531_v49, -inf  ;;  %v1030_v43 = vsel %vm88_vm2, %v2533_v41, -inf }
 0x685   :  { %v983_v47 = vmax.f32 %v981_v15, %v982_v16  ;;  %v990_v44 = vmax.f32 %v988_v34, %v989_v20  ;;  %v997_v22 = vmax.f32 %v995_v14, %v996_v63  ;;  %v1004_v54 = vmax.f32 %v1002_v9, %v1003_v11 }
 0x686   :  { %v1010_v50 = vrot.slane %v1009_v26, 4  ;;  %v1017_v48 = vrot.slane %v1016_v30, 4  ;;  %v1024_v37 = vrot.slane %v1023_v32, 4  ;;  %v1031_v8 = vrot.slane %v1030_v43, 4 }
 0x687   :  { %v984_v42 = vrot.slane %v983_v47, 2  ;;  %v991_v31 = vrot.slane %v990_v44, 2  ;;  %v998_v57 = vrot.slane %v997_v22, 2  ;;  %v1005_v7 = vrot.slane %v1004_v54, 2 }
 0x688   :  { %v1011_v59 = vmax.f32 %v1009_v26, %v1010_v50  ;;  %v1018_v17 = vmax.f32 %v1016_v30, %v1017_v48  ;;  %v1025_v55 = vmax.f32 %v1023_v32, %v1024_v37  ;;  %v1032_v10 = vmax.f32 %v1030_v43, %v1031_v8 }
 0x689   :  { %v985_v18 = vmax.f32 %v983_v47, %v984_v42  ;;  %v992_v19 = vmax.f32 %v990_v44, %v991_v31  ;;  %v999_v33 = vmax.f32 %v997_v22, %v998_v57  ;;  %v1006_v45 = vmax.f32 %v1004_v54, %v1005_v7 }
 0x68a   :  { %v1012_v0 = vrot.slane %v1011_v59, 2  ;;  %v1019_v25 = vrot.slane %v1018_v17, 2  ;;  %v1026_v56 = vrot.slane %v1025_v55, 2  ;;  %v1033_v61 = vrot.slane %v1032_v10, 2 }
 0x68b   :  { %v986_v23 = vrot.slane %v985_v18, 1  ;;  %v993_v21 = vrot.slane %v992_v19, 1  ;;  %v1000_v1 = vrot.slane %v999_v33, 1  ;;  %v1007_v2 = vrot.slane %v1006_v45, 1 }
 0x68c   :  { %v1013_v3 = vmax.f32 %v1011_v59, %v1012_v0  ;;  %v1020_v38 = vmax.f32 %v1018_v17, %v1019_v25  ;;  %v1027_v24 = vmax.f32 %v1025_v55, %v1026_v56  ;;  %v1034_v12 = vmax.f32 %v1032_v10, %v1033_v61 }
 0x68d   :  { %v987_v4 = vmax.f32 %v985_v18, %v986_v23  ;;  %v994_v29 = vmax.f32 %v992_v19, %v993_v21  ;;  %v1001_v28 = vmax.f32 %v999_v33, %v1000_v1  ;;  %v1008_v35 = vmax.f32 %v1006_v45, %v1007_v2 }
 0x68e   :  { %v1014_v51 = vrot.slane %v1013_v3, 1  ;;  %v1021_v40 = vrot.slane %v1020_v38, 1  ;;  %v1028_v5 = vrot.slane %v1027_v24, 1  ;;  %v1035_v36 = vrot.slane %v1034_v12, 1 }
 0x68f   :  { %v1037_v15 = vsub.f32 %v2519_v53, %v987_v4  ;;  %v1038_v34 = vsub.f32 %v2521_v52, %v994_v29  ;;  %v1039_v14 = vsub.f32 %v2523_v46, %v1001_v28  ;;  %v1040_v9 = vsub.f32 %v2525_v6, %v1008_v35 }
 0x690   :  { %v1015_v16 = vmax.f32 %v1013_v3, %v1014_v51  ;;  %v1022_v20 = vmax.f32 %v1020_v38, %v1021_v40  ;;  %v1029_v63 = vmax.f32 %v1027_v24, %v1028_v5  ;;  %v1036_v11 = vmax.f32 %v1034_v12, %v1035_v36 }
 0x691   :  { %v1045_v26 = vmul.f32 1.442695, %v1037_v15  ;;  %v1047_v30 = vmul.f32 1.442695, %v1038_v34  ;;  %v1049_v32 = vmul.f32 1.442695, %v1039_v14 }
 0x692   :  { %v1041_v43 = vsub.f32 %v2527_v39, %v1015_v16  ;;  %v1042_v47 = vsub.f32 %v2529_v27, %v1022_v20  ;;  %v1043_v44 = vsub.f32 %v2531_v49, %v1029_v63  ;;  %v1044_v53 = vsub.f32 %v2533_v41, %v1036_v11 }
 0x693   :  { %1929 = vpow2.f32 %v1045_v26  ;;  %v1051_v52 = vmul.f32 1.442695, %v1040_v9 }
 0x694   :  { %1931 = vpow2.f32 %v1047_v30  ;;  %v1053_v46 = vmul.f32 1.442695, %v1041_v43  ;;  %v1055_v6 = vmul.f32 1.442695, %v1042_v47  ;;  %v1057_v22 = vmul.f32 1.442695, %v1043_v44 }
 0x695   :  { %1933 = vpow2.f32 %v1049_v32  ;;  %v1059_v54 = vmul.f32 1.442695, %v1044_v53 }
 0x696   :  { %1935 = vpow2.f32 %v1051_v52 }
 0x697   :  { %1937 = vpow2.f32 %v1053_v46 }
 0x698   :  { %1939 = vpow2.f32 %v1055_v6 }
 0x699   :  { %v2559_v50 = vpop.eup %1929  ;;  %1941 = vpow2.f32 %v1057_v22 }
 0x69a   :  { %v2561_v39 = vpop.eup %1931  ;;  %1943 = vpow2.f32 %v1059_v54  ;;  %v1061_v27 = vsel %vm88_vm2, %v2559_v50, 0.0 }
 0x69b   :  { %v2565_v49 = vpop.eup %1933  ;;  %v1062_v41 = vrot.slane %v1061_v27, 4  ;;  %v1068_v48 = vsel %vm88_vm2, %v2561_v39, 0.0 }
 0x69c   :  { %v2569_v37 = vpop.eup %1935  ;;  %v1069_v8 = vrot.slane %v1068_v48, 4  ;;  %v1075_v42 = vsel %vm88_vm2, %v2565_v49, 0.0 }
 0x69d   :  { %v2573_v31 = vpop.eup %1937  ;;  %v1063_v57 = vadd.f32 %v1062_v41, %v1061_v27  ;;  %v1076_v7 = vrot.slane %v1075_v42, 4  ;;  %v1082_v59 = vsel %vm88_vm2, %v2569_v37, 0.0  ;;  %v1201_v41 = vrot.slane %v2513_v62, 1 }
 0x69e   :  { %v2577_v17 = vpop.eup %1939  ;;  %v1070_v55 = vadd.f32 %v1069_v8, %v1068_v48  ;;  %v1083_v10 = vrot.slane %v1082_v59, 4  ;;  %v1089_v18 = vsel %vm88_vm2, %v2573_v31, 0.0  ;;  %v1202_v8 = vrot.slane %v2513_v62, 2 }
 0x69f   :  { %v2581_v19 = vpop.eup %1941  ;;  %v1064_v33 = vrot.slane %v1063_v57, 2  ;;  %v1077_v45 = vadd.f32 %v1076_v7, %v1075_v42  ;;  %v1090_v0 = vrot.slane %v1089_v18, 4  ;;  %v1096_v25 = vsel %vm88_vm2, %v2577_v17, 0.0 }
 0x6a0   :  { %v2585_v56 = vpop.eup %1943  ;;  %v1071_v61 = vrot.slane %v1070_v55, 2  ;;  %v1084_v23 = vadd.f32 %v1083_v10, %v1082_v59  ;;  %v1097_v21 = vrot.slane %v1096_v25, 4  ;;  %v1103_v1 = vsel %vm88_vm2, %v2581_v19, 0.0 }
 0x6a1   :  { %v1078_v2 = vrot.slane %v1077_v45, 2  ;;  %v1091_v3 = vadd.f32 %v1090_v0, %v1089_v18  ;;  %v1104_v38 = vrot.slane %v1103_v1, 4  ;;  %v1110_v24 = vsel %vm88_vm2, %v2585_v56, 0.0 }
 0x6a2   :  { %v1085_v12 = vrot.slane %v1084_v23, 2  ;;  %v1098_v4 = vadd.f32 %v1097_v21, %v1096_v25  ;;  %v1111_v29 = vrot.slane %v1110_v24, 4  ;;  %v1065_v28 = vadd.f32 %v1064_v33, %v1063_v57  ;;  %v2600_v21 = vpop.permute.xlu1 %1133 }
 0x6a3   :  { %v1092_v35 = vrot.slane %v1091_v3, 2  ;;  %v1105_v51 = vadd.f32 %v1104_v38, %v1103_v1  ;;  %v1072_v40 = vadd.f32 %v1071_v61, %v1070_v55  ;;  %v1079_v5 = vadd.f32 %v1078_v2, %v1077_v45 }
 0x6a4   :  { %v1099_v36 = vrot.slane %v1098_v4, 2  ;;  %v1066_v15 = vrot.slane %v1065_v28, 1  ;;  %v1086_v34 = vadd.f32 %v1085_v12, %v1084_v23  ;;  %v1112_v14 = vadd.f32 %v1111_v29, %v1110_v24 }
 0x6a5   :  { %v1106_v9 = vrot.slane %v1105_v51, 2  ;;  %v1073_v16 = vrot.slane %v1072_v40, 1  ;;  %v1080_v20 = vrot.slane %v1079_v5, 1  ;;  %v1093_v63 = vadd.f32 %v1092_v35, %v1091_v3 }
 0x6a6   :  { %v1067_v11 = vadd.f32 %v1066_v15, %v1065_v28  ;;  %v1087_v26 = vrot.slane %v1086_v34, 1  ;;  %v1100_v30 = vadd.f32 %v1099_v36, %v1098_v4  ;;  %v1113_v32 = vrot.slane %v1112_v14, 2 }
 0x6a7   :  { %v1074_v43 = vadd.f32 %v1073_v16, %v1072_v40  ;;  %v1081_v47 = vadd.f32 %v1080_v20, %v1079_v5  ;;  %v1094_v44 = vrot.slane %v1093_v63, 1  ;;  %v1107_v53 = vadd.f32 %v1106_v9, %v1105_v51 }
 0x6a8   :  { %v1088_v52 = vadd.f32 %v1087_v26, %v1086_v34  ;;  %v1101_v46 = vrot.slane %v1100_v30, 1  ;;  %1945 = vrcp.f32 %v1067_v11  ;;  %v1114_v6 = vadd.f32 %v1113_v32, %v1112_v14 }
 0x6a9   :  { %v1095_v22 = vadd.f32 %v1094_v44, %v1093_v63  ;;  %1947 = vrcp.f32 %v1074_v43  ;;  %v1108_v27 = vrot.slane %v1107_v53, 1  ;;  %v1203_v42 = vrot.slane %v2513_v62, 3 }
 0x6aa   :  { %v1102_v54 = vadd.f32 %v1101_v46, %v1100_v30  ;;  %1949 = vrcp.f32 %v1081_v47  ;;  %v1115_v48 = vrot.slane %v1114_v6, 1  ;;  %v1204_v57 = vrot.slane %v2513_v62, 4 }
 0x6ab   :  { %1951 = vrcp.f32 %v1088_v52  ;;  %v1205_v7 = vrot.slane %v2513_v62, 5  ;;  %v1206_v59 = vrot.slane %v2513_v62, 6  ;;  %v1207_v10 = vrot.slane %v2513_v62, 7 }
 0x6ac   :  { %1953 = vrcp.f32 %v1095_v22  ;;  %v1109_v18 = vadd.f32 %v1108_v27, %v1107_v53  ;;  %v1208_v0 = vperm.slane %v2513_v62, 0  ;;  %v1209_v25 = vperm.slane %v1201_v41, 0 }
 0x6ad   :  { %1955 = vrcp.f32 %v1102_v54  ;;  %v1116_v61 = vadd.f32 %v1115_v48, %v1114_v6  ;;  %v1210_v2 = vperm.slane %v1202_v8, 0  ;;  %v1211_v3 = vperm.slane %v1203_v42, 0 }
 0x6ae   :  { %v1946_v55 = vpop.eup %1945  ;;  %v1212_v38 = vperm.slane %v1204_v57, 0  ;;  %v1213_v29 = vperm.slane %v1205_v7, 0  ;;  %v1214_v28 = vperm.slane %v1206_v59, 0  ;;  %v1215_v51 = vperm.slane %v1207_v10, 0 }
 0x6af   :  { %v1948_v33 = vpop.eup %1947  ;;  %v1125_v45 = vmul.f32 %v1946_v55, %v2559_v50  ;;  %1957 = vrcp.f32 %v1109_v18 }
 0x6b0   :  { %v1950_v23 = vpop.eup %1949  ;;  %v1126_v1 = vmul.f32 %v1948_v33, %v2561_v39  ;;  %1959 = vrcp.f32 %v1116_v61  ;;  %v1781_v33 = vld [vmem:[%s2887_s3 + $0x90] sm:$0xff] }
 0x6b1   :  { %v1952_v24 = vpop.eup %1951  ;;  %v1127_v12 = vmul.f32 %v1950_v23, %v2565_v49  ;;  %v1136_v4 = vmul.f32 %v2600_v21, %v1125_v45  ;;  %1503 = vmatpush.msra.mxu2 %v1781_v33 }
 0x6b2   :  { %v1954_v50 = vpop.eup %1953  ;;  %v1128_v62 = vmul.f32 %v1952_v24, %v2569_v37  ;;  %v1137_v35 = vmul.f32 %v2600_v21, %v1126_v1 }
 0x6b3   :  { %v1956_v40 = vpop.eup %1955  ;;  %v1129_v39 = vmul.f32 %v1954_v50, %v2573_v31  ;;  %v1138_v5 = vmul.f32 %v2600_v21, %v1127_v12  ;;  %v1144_v36 = vsel %vm88_vm2, %v1136_v4, 0.0 }
 0x6b4   :  { %v1130_v49 = vmul.f32 %v1956_v40, %v2577_v17  ;;  %v1139_v15 = vmul.f32 %v2600_v21, %v1128_v62  ;;  %v1145_v34 = vrot.slane %v1144_v36, 4  ;;  %v1151_v14 = vsel %vm88_vm2, %v1137_v35, 0.0  ;;  %v1225_v37 = vpop.permute.xlu0 %1224 }
 0x6b5   :  { %v1140_v9 = vmul.f32 %v2600_v21, %v1129_v39  ;;  %v1152_v16 = vrot.slane %v1151_v14, 4  ;;  %v1158_v20 = vsel %vm88_vm2, %v1138_v5, 0.0  ;;  %v2615_v63 = vmul.f32 %v1225_v37, %v1208_v0  ;;  %v2626_v44 = vpop.eup %1957 }
 0x6b6   :  { %v2618_v31 = vmul.f32 %v2600_v21, %v1130_v49  ;;  %v1146_v11 = vadd.f32 %v1145_v34, %v1144_v36  ;;  %v1159_v26 = vrot.slane %v1158_v20, 4  ;;  %v1165_v17 = vsel %vm88_vm2, %v1139_v15, 0.0  ;;  %v2633_v22 = vpop.eup %1959 }
 0x6b7   :  { %v1153_v30 = vadd.f32 %v1152_v16, %v1151_v14  ;;  %v1166_v32 = vrot.slane %v1165_v17, 4  ;;  %v2622_v43 = vsel %vm88_vm2, %v1140_v9, 0.0  ;;  %v2624_v47 = vmul.f32 %v1225_v37, %v1209_v25 }
 0x6b8   :  { %v1147_v53 = vrot.slane %v1146_v11, 2  ;;  %v2628_v52 = vadd.f32 %v1159_v26, %v1158_v20  ;;  %v1173_v46 = vrot.slane %v2622_v43, 4  ;;  %v2631_v6 = vmul.f32 %v1225_v37, %v1210_v2 }
 0x6b9   :  { %v1154_v54 = vrot.slane %v1153_v30, 2  ;;  %v2635_v27 = vadd.f32 %v1166_v32, %v1165_v17  ;;  %v2637_v41 = vmul.f32 %v1225_v37, %v1211_v3  ;;  %v2639_v48 = vmul.f32 %v1225_v37, %v1212_v38  ;;  %v1780_v38 = vld [vmem:[%s2887_s3 + $0x88] sm:$0xff] }
 0x6ba   :  { %v2641_v8 = vadd.f32 %v1147_v53, %v1146_v11  ;;  %v1161_v42 = vrot.slane %v2628_v52, 2  ;;  %v2644_v57 = vmul.f32 %v1225_v37, %v1213_v29  ;;  %v2646_v7 = vmul.f32 %v1225_v37, %v1214_v28  ;;  %1504 = vmatpush.msra.mxu2 %v1780_v38 }
 0x6bb   :  { %v2648_v59 = vadd.f32 %v1154_v54, %v1153_v30  ;;  %v2650_v55 = vmul.f32 %v1225_v37, %v1215_v51  ;;  %v1235_v10 = vsel %vm88_vm2, %v2615_v63, -inf  ;;  %v1242_v18 = vsel %vm88_vm2, %v2624_v47, -inf }
 0x6bc   :  { %v1236_v45 = vrot.slane %v1235_v10, 4  ;;  %v1243_v0 = vrot.slane %v1242_v18, 4  ;;  %v1249_v25 = vsel %vm88_vm2, %v2631_v6, -inf  ;;  %v1256_v61 = vsel %vm88_vm2, %v2637_v41, -inf }
 0x6bd   :  { %v1250_v23 = vrot.slane %v1249_v25, 4  ;;  %v1257_v1 = vrot.slane %v1256_v61, 4  ;;  %v1263_v2 = vsel %vm88_vm2, %v2639_v48, -inf  ;;  %v1270_v3 = vsel %vm88_vm2, %v2644_v57, -inf }
 0x6be   :  { %v1237_v24 = vmax.f32 %v1235_v10, %v1236_v45  ;;  %v1244_v12 = vmax.f32 %v1242_v18, %v1243_v0  ;;  %v1264_v4 = vrot.slane %v1263_v2, 4  ;;  %v1271_v29 = vrot.slane %v1270_v3, 4 }
 0x6bf   :  { %v1251_v28 = vmax.f32 %v1249_v25, %v1250_v23  ;;  %v1258_v50 = vmax.f32 %v1256_v61, %v1257_v1  ;;  %v1277_v62 = vsel %vm88_vm2, %v2646_v7, -inf  ;;  %v1284_v35 = vsel %vm88_vm2, %v2650_v55, -inf }
 0x6c0   :  { %v1238_v51 = vrot.slane %v1237_v24, 2  ;;  %v1245_v40 = vrot.slane %v1244_v12, 2  ;;  %v1265_v39 = vmax.f32 %v1263_v2, %v1264_v4  ;;  %v1272_v5 = vmax.f32 %v1270_v3, %v1271_v29 }
 0x6c1   :  { %v1252_v36 = vrot.slane %v1251_v28, 2  ;;  %v1259_v49 = vrot.slane %v1258_v50, 2  ;;  %v1278_v15 = vrot.slane %v1277_v62, 4  ;;  %v1285_v34 = vrot.slane %v1284_v35, 4 }
 0x6c2   :  { %v1239_v14 = vmax.f32 %v1237_v24, %v1238_v51  ;;  %v1246_v37 = vmax.f32 %v1244_v12, %v1245_v40  ;;  %v1266_v9 = vrot.slane %v1265_v39, 2  ;;  %v1273_v16 = vrot.slane %v1272_v5, 2 }
 0x6c3   :  { %v1253_v20 = vmax.f32 %v1251_v28, %v1252_v36  ;;  %v1260_v11 = vmax.f32 %v1258_v50, %v1259_v49  ;;  %v1279_v26 = vmax.f32 %v1277_v62, %v1278_v15  ;;  %v1286_v17 = vmax.f32 %v1284_v35, %v1285_v34 }
 0x6c4   :  { %v1240_v30 = vrot.slane %v1239_v14, 1  ;;  %v1247_v32 = vrot.slane %v1246_v37, 1  ;;  %v1267_v53 = vmax.f32 %v1265_v39, %v1266_v9  ;;  %v1274_v54 = vmax.f32 %v1272_v5, %v1273_v16 }
 0x6c5   :  { %v1254_v10 = vrot.slane %v1253_v20, 1  ;;  %v1261_v18 = vrot.slane %v1260_v11, 1  ;;  %v1280_v33 = vrot.slane %v1279_v26, 2  ;;  %v1287_v45 = vrot.slane %v1286_v17, 2 }
 0x6c6   :  { %v1241_v0 = vmax.f32 %v1239_v14, %v1240_v30  ;;  %v1248_v25 = vmax.f32 %v1246_v37, %v1247_v32  ;;  %v1268_v61 = vrot.slane %v1267_v53, 1  ;;  %v1275_v23 = vrot.slane %v1274_v54, 1 }
 0x6c7   :  { %v1255_v1 = vmax.f32 %v1253_v20, %v1254_v10  ;;  %v1262_v2 = vmax.f32 %v1260_v11, %v1261_v18  ;;  %v1281_v3 = vmax.f32 %v1279_v26, %v1280_v33  ;;  %v1288_v38 = vmax.f32 %v1286_v17, %v1287_v45 }
 0x6c8   :  { %v1269_v24 = vmax.f32 %v1267_v53, %v1268_v61  ;;  %v1276_v12 = vmax.f32 %v1274_v54, %v1275_v23  ;;  %v1291_v4 = vsub.f32 %v2615_v63, %v1241_v0  ;;  %v1292_v29 = vsub.f32 %v2624_v47, %v1248_v25 }
 0x6c9   :  { %v1282_v28 = vrot.slane %v1281_v3, 1  ;;  %v1289_v50 = vrot.slane %v1288_v38, 1  ;;  %v1293_v62 = vsub.f32 %v2631_v6, %v1255_v1  ;;  %v1294_v35 = vsub.f32 %v2637_v41, %v1262_v2 }
 0x6ca   :  { %v1295_v51 = vsub.f32 %v2639_v48, %v1269_v24  ;;  %v1296_v40 = vsub.f32 %v2644_v57, %v1276_v12  ;;  %v1299_v39 = vmul.f32 1.442695, %v1291_v4  ;;  %v1301_v5 = vmul.f32 1.442695, %v1292_v29 }
 0x6cb   :  { %v1283_v36 = vmax.f32 %v1281_v3, %v1282_v28  ;;  %v1290_v49 = vmax.f32 %v1288_v38, %v1289_v50  ;;  %v1303_v15 = vmul.f32 1.442695, %v1293_v62  ;;  %v1305_v34 = vmul.f32 1.442695, %v1294_v35 }
 0x6cc   :  { %1961 = vpow2.f32 %v1299_v39  ;;  %v1307_v63 = vmul.f32 1.442695, %v1295_v51  ;;  %v1309_v14 = vmul.f32 1.442695, %v1296_v40  ;;  %v1131_v47 = vmul.f32 %v2626_v44, %v2581_v19 }
 0x6cd   :  { %v1297_v6 = vsub.f32 %v2646_v7, %v1283_v36  ;;  %v1298_v41 = vsub.f32 %v2650_v55, %v1290_v49  ;;  %1963 = vpow2.f32 %v1301_v5  ;;  %v1132_v48 = vmul.f32 %v2633_v22, %v2585_v56 }
 0x6ce   :  { %1965 = vpow2.f32 %v1303_v15  ;;  %v1142_v57 = vmul.f32 %v2600_v21, %v1131_v47  ;;  %v1149_v37 = vrot.slane %v2641_v8, 1  ;;  %v1156_v20 = vrot.slane %v2648_v59, 1 }
 0x6cf   :  { %1967 = vpow2.f32 %v1305_v34  ;;  %v1311_v9 = vmul.f32 1.442695, %v1297_v6  ;;  %v2688_v16 = vmul.f32 1.442695, %v1298_v41  ;;  %v2692_v19 = vmul.f32 %v2600_v21, %v1132_v48 }
 0x6d0   :  { %1969 = vpow2.f32 %v1307_v63  ;;  %v2695_v44 = vadd.f32 %v1149_v37, %v2641_v8  ;;  %v1162_v56 = vadd.f32 %v1161_v42, %v2628_v52  ;;  %v1168_v22 = vrot.slane %v2635_v27, 2 }
 0x6d1   :  { %1971 = vpow2.f32 %v1309_v14  ;;  %v1174_v7 = vadd.f32 %v1173_v46, %v2622_v43  ;;  %v1179_v55 = vsel %vm88_vm2, %v2618_v31, 0.0  ;;  %v1186_v26 = vsel %vm88_vm2, %v1142_v57, 0.0 }
 0x6d2   :  { %v2706_v11 = vpop.eup %1961  ;;  %1973 = vpow2.f32 %v1311_v9  ;;  %v1163_v21 = vrot.slane %v1162_v56, 1  ;;  %v1180_v8 = vrot.slane %v1179_v55, 4  ;;  %v1157_v42 = vadd.f32 %v1156_v20, %v2648_v59 }
 0x6d3   :  { %v2709_v17 = vpop.eup %1963  ;;  %v1315_v52 = vsel %vm88_vm2, %v2706_v11, 0.0  ;;  %v1169_v30 = vadd.f32 %v1168_v22, %v2635_v27  ;;  %v1175_v43 = vrot.slane %v1174_v7, 2  ;;  %v1187_v54 = vrot.slane %v1186_v26, 4 }
 0x6d4   :  { %v2715_v46 = vpop.eup %1965  ;;  %v1316_v31 = vrot.slane %v1315_v52, 4  ;;  %v1322_v32 = vsel %vm88_vm2, %v2709_v17, 0.0  ;;  %v1181_v53 = vadd.f32 %v1180_v8, %v1179_v55  ;;  %v1164_v45 = vadd.f32 %v1163_v21, %v1162_v56 }
 0x6d5   :  { %v2719_v10 = vpop.eup %1967  ;;  %v1323_v18 = vrot.slane %v1322_v32, 4  ;;  %v1329_v33 = vsel %vm88_vm2, %v2715_v46, 0.0  ;;  %v1170_v0 = vrot.slane %v1169_v30, 1  ;;  %v1176_v23 = vadd.f32 %v1175_v43, %v1174_v7 }
 0x6d6   :  { %v2723_v59 = vpop.eup %1969  ;;  %v1317_v27 = vadd.f32 %v1316_v31, %v1315_v52  ;;  %v1330_v25 = vrot.slane %v1329_v33, 4  ;;  %v1336_v61 = vsel %vm88_vm2, %v2719_v10, 0.0  ;;  %v1182_v24 = vrot.slane %v1181_v53, 2 }
 0x6d7   :  { %v2727_v1 = vpop.eup %1971  ;;  %v1324_v2 = vadd.f32 %v1323_v18, %v1322_v32  ;;  %v1337_v3 = vrot.slane %v1336_v61, 4  ;;  %v1343_v38 = vsel %vm88_vm2, %v2723_v59, 0.0  ;;  %v1171_v49 = vadd.f32 %v1170_v0, %v1169_v30 }
 0x6d8   :  { %v2731_v12 = vpop.eup %1973  ;;  %v1318_v4 = vrot.slane %v1317_v27, 2  ;;  %v1331_v29 = vadd.f32 %v1330_v25, %v1329_v33  ;;  %v1344_v28 = vrot.slane %v1343_v38, 4  ;;  %v1350_v50 = vsel %vm88_vm2, %v2727_v1, 0.0 }
 0x6d9   :  { %v1325_v62 = vrot.slane %v1324_v2, 2  ;;  %v1338_v35 = vadd.f32 %v1337_v3, %v1336_v61  ;;  %v1351_v51 = vrot.slane %v1350_v50, 4  ;;  %v1357_v40 = vsel %vm88_vm2, %v2731_v12, 0.0 }
 0x6da   :  { %v1319_v39 = vadd.f32 %v1318_v4, %v1317_v27  ;;  %v1332_v5 = vrot.slane %v1331_v29, 2  ;;  %v1345_v36 = vadd.f32 %v1344_v28, %v1343_v38  ;;  %v1358_v14 = vrot.slane %v1357_v40, 4 }
 0x6db   :  { %v1326_v15 = vadd.f32 %v1325_v62, %v1324_v2  ;;  %v1339_v34 = vrot.slane %v1338_v35, 2  ;;  %v1352_v63 = vadd.f32 %v1351_v51, %v1350_v50  ;;  %v1177_v41 = vrot.slane %v1176_v23, 1  ;;  %v2749_v51 = vpop.permute.xlu2 %1387 }
 0x6dc   :  { %v1320_v47 = vrot.slane %v1319_v39, 1  ;;  %v1333_v6 = vadd.f32 %v1332_v5, %v1331_v29  ;;  %v1183_v48 = vadd.f32 %v1182_v24, %v1181_v53  ;;  %v1346_v9 = vrot.slane %v1345_v36, 2 }
 0x6dd   :  { %v1327_v57 = vrot.slane %v1326_v15, 1  ;;  %v1340_v37 = vadd.f32 %v1339_v34, %v1338_v35  ;;  %v1188_v20 = vadd.f32 %v1187_v54, %v1186_v26  ;;  %v1193_v55 = vsel %vm88_vm2, %v2692_v19, 0.0 }
 0x6de   :  { %v1321_v56 = vadd.f32 %v1320_v47, %v1319_v39  ;;  %v1334_v22 = vrot.slane %v1333_v6, 1  ;;  %v1184_v7 = vrot.slane %v1183_v48, 1  ;;  %v1194_v52 = vrot.slane %v1193_v55, 4 }
 0x6df   :  { %v1328_v21 = vadd.f32 %v1327_v57, %v1326_v15  ;;  %v1189_v8 = vrot.slane %v1188_v20, 2  ;;  %v1462_v30 = vsel %vm634_vm3, %v1157_v42, %v2695_v44  ;;  %v1178_v43 = vadd.f32 %v1177_v41, %v1176_v23 }
 0x6e0   :  { %1975 = vrcp.f32 %v1321_v56  ;;  %v1463_v31 = vsel %vm636_vm4, %v1164_v45, %v1462_v30  ;;  %v1335_v32 = vadd.f32 %v1334_v22, %v1333_v6  ;;  %v1195_v26 = vadd.f32 %v1194_v52, %v1193_v55 }
 0x6e1   :  { %1977 = vrcp.f32 %v1328_v21  ;;  %v1190_v53 = vadd.f32 %v1189_v8, %v1188_v20  ;;  %v1464_v54 = vsel %vm638_vm5, %v1171_v49, %v1463_v31  ;;  %v1341_v19 = vrot.slane %v1340_v37, 1 }
 0x6e2   :  { %v1465_v18 = vsel %vm640_vm6, %v1178_v43, %v1464_v54  ;;  %1979 = vpow2.f32 %v2688_v16  ;;  %v1347_v33 = vadd.f32 %v1346_v9, %v1345_v36  ;;  %v1185_v0 = vadd.f32 %v1184_v7, %v1183_v48 }
 0x6e3   :  { %v1191_v27 = vrot.slane %v1190_v53, 1  ;;  %v1196_v25 = vrot.slane %v1195_v26, 2  ;;  %v1353_v44 = vrot.slane %v1352_v63, 2  ;;  %v1342_v42 = vadd.f32 %v1341_v19, %v1340_v37 }
 0x6e4   :  { %v1348_v61 = vrot.slane %v1347_v33, 1  ;;  %v1359_v23 = vadd.f32 %v1358_v14, %v1357_v40  ;;  %1981 = vrcp.f32 %v1335_v32  ;;  %v1466_v2 = vsel %vm642_vm7, %v1185_v0, %v1465_v18 }
 0x6e5   :  { %v1197_v45 = vadd.f32 %v1196_v25, %v1195_v26  ;;  %v1354_v3 = vadd.f32 %v1353_v44, %v1352_v63  ;;  %v1192_v24 = vadd.f32 %v1191_v27, %v1190_v53  ;;  %1983 = vrcp.f32 %v1342_v42 }
 0x6e6   :  { %v1976_v38 = vpop.eup %1975  ;;  %v1349_v4 = vadd.f32 %v1348_v61, %v1347_v33  ;;  %v1360_v29 = vrot.slane %v1359_v23, 2 }
 0x6e7   :  { %v1978_v16 = vpop.eup %1977  ;;  %v1198_v28 = vrot.slane %v1197_v45, 1  ;;  %v1355_v50 = vrot.slane %v1354_v3, 1  ;;  %v1379_v62 = vmul.f32 %v1976_v38, %v2706_v11  ;;  %v1467_v40 = vsel %vm644_vm8, %v1192_v24, %v1466_v2 }
 0x6e8   :  { %v2747_v35 = vpop.eup %1979  ;;  %v1361_v39 = vadd.f32 %v1360_v29, %v1359_v23  ;;  %1985 = vrcp.f32 %v1349_v4  ;;  %v1380_v5 = vmul.f32 %v1978_v16, %v2709_v17 }
 0x6e9   :  { %v1199_v36 = vadd.f32 %v1198_v28, %v1197_v45  ;;  %v1356_v49 = vadd.f32 %v1355_v50, %v1354_v3  ;;  %v1364_v15 = vsel %vm88_vm2, %v2747_v35, 0.0  ;;  %v1390_v34 = vmul.f32 %v2749_v51, %v1379_v62 }
 0x6ea   :  { %v1982_v63 = vpop.eup %1981  ;;  %v1362_v14 = vrot.slane %v1361_v39, 1  ;;  %v1365_v11 = vrot.slane %v1364_v15, 4  ;;  %v1391_v47 = vmul.f32 %v2749_v51, %v1380_v5 }
 0x6eb   :  { %v1468_v6 = vsel %vm646_vm9, %v1199_v36, %v1467_v40  ;;  %1987 = vrcp.f32 %v1356_v49  ;;  %v1381_v41 = vmul.f32 %v1982_v63, %v2715_v46  ;;  %v1398_v48 = vsel %vm88_vm2, %v1390_v34, 0.0  ;;  %v1984_v17 = vpop.eup %1983 }
 0x6ec   :  { %1802 = vmatmul.msk.f32.vlgmr.msra.gmra.mxu2 %vm88_vm2, %v1468_v6  ;;  %v1363_v57 = vadd.f32 %v1362_v14, %v1361_v39  ;;  %v1366_v37 = vadd.f32 %v1365_v11, %v1364_v15  ;;  %v1399_v9 = vrot.slane %v1398_v48, 4  ;;  %v1405_v20 = vsel %vm88_vm2, %v1391_v47, 0.0 }
 0x6ed   :  { %v1382_v56 = vmul.f32 %v1984_v17, %v2719_v10  ;;  %v1392_v22 = vmul.f32 %v2749_v51, %v1381_v41  ;;  %v1406_v7 = vrot.slane %v1405_v20, 4 }
 0x6ee   :  { %v1986_v55 = vpop.eup %1985  ;;  %v1367_v21 = vrot.slane %v1366_v37, 2  ;;  %1989 = vrcp.f32 %v1363_v57  ;;  %v1400_v8 = vadd.f32 %v1399_v9, %v1398_v48 }
 0x6ef   :  { %v1383_v46 = vmul.f32 %v1986_v55, %v2723_v59  ;;  %v1393_v52 = vmul.f32 %v2749_v51, %v1382_v56  ;;  %v1407_v30 = vadd.f32 %v1406_v7, %v1405_v20  ;;  %v1412_v43 = vsel %vm88_vm2, %v1392_v22, 0.0 }
 0x6f0   :  { %v1368_v31 = vadd.f32 %v1367_v21, %v1366_v37  ;;  %v1401_v32 = vrot.slane %v1400_v8, 2  ;;  %v1413_v53 = vrot.slane %v1412_v43, 4 }
 0x6f1   :  { %v1988_v26 = vpop.eup %1987  ;;  %v1394_v10 = vmul.f32 %v2749_v51, %v1383_v46  ;;  %v1408_v54 = vrot.slane %v1407_v30, 2  ;;  %v1419_v18 = vsel %vm88_vm2, %v1393_v52, 0.0 }
 0x6f2   :  { %v1369_v19 = vrot.slane %v1368_v31, 1  ;;  %v1384_v33 = vmul.f32 %v1988_v26, %v2727_v1  ;;  %v1402_v0 = vadd.f32 %v1401_v32, %v1400_v8  ;;  %v1414_v27 = vadd.f32 %v1413_v53, %v1412_v43 }
 0x6f3   :  { %v1409_v59 = vadd.f32 %v1408_v54, %v1407_v30  ;;  %v1420_v25 = vrot.slane %v1419_v18, 4  ;;  %v1426_v44 = vsel %vm88_vm2, %v1394_v10, 0.0 }
 0x6f4   :  { %v1990_v42 = vpop.eup %1989  ;;  %v1370_v61 = vadd.f32 %v1369_v19, %v1368_v31  ;;  %v1395_v23 = vmul.f32 %v2749_v51, %v1384_v33  ;;  %v1403_v45 = vrot.slane %v1402_v0, 1  ;;  %v1415_v2 = vrot.slane %v1414_v27, 2  ;;  %v1835_v33 = vld [vmem:[%s2887_s3 + $0xe9] ss:$0 sm:$0xff] }
 0x6f5   :  { %v1385_v3 = vmul.f32 %v1990_v42, %v2731_v12  ;;  %v1410_v38 = vrot.slane %v1409_v59, 1  ;;  %v1421_v24 = vadd.f32 %v1420_v25, %v1419_v18  ;;  %v1427_v4 = vrot.slane %v1426_v44, 4 }
 0x6f6   :  { %1991 = vrcp.f32 %v1370_v61  ;;  %v1416_v29 = vadd.f32 %v1415_v2, %v1414_v27  ;;  %v1433_v1 = vsel %vm88_vm2, %v1395_v23, 0.0  ;;  %v1404_v62 = vadd.f32 %v1403_v45, %v1402_v0 }
 0x6f7   :  { %v1396_v16 = vmul.f32 %v2749_v51, %v1385_v3  ;;  %v1422_v28 = vrot.slane %v1421_v24, 2  ;;  %v1428_v50 = vadd.f32 %v1427_v4, %v1426_v44  ;;  %v1411_v40 = vadd.f32 %v1410_v38, %v1409_v59 }
 0x6f8   :  { %v1417_v39 = vrot.slane %v1416_v29, 1  ;;  %v1434_v5 = vrot.slane %v1433_v1, 4 }
 0x6f9   :  { %v1423_v36 = vadd.f32 %v1422_v28, %v1421_v24  ;;  %v1429_v49 = vrot.slane %v1428_v50, 2  ;;  %v1440_v15 = vsel %vm88_vm2, %v1396_v16, 0.0  ;;  %v1477_v48 = vsel %vm634_vm3, %v1411_v40, %v1404_v62  ;;  %v1782_v28 = vld [vmem:[%s2887_s3 + $0x98] sm:$0xff] }
 0x6fa   :  { %v1435_v12 = vadd.f32 %v1434_v5, %v1433_v1  ;;  %v1441_v34 = vrot.slane %v1440_v15, 4  ;;  %v1418_v63 = vadd.f32 %v1417_v39, %v1416_v29 }
 0x6fb   :  { %v1430_v14 = vadd.f32 %v1429_v49, %v1428_v50  ;;  %v1424_v47 = vrot.slane %v1423_v36, 1 }
 0x6fc   :  { %v1992_v11 = vpop.eup %1991  ;;  %v1436_v6 = vrot.slane %v1435_v12, 2  ;;  %v1442_v41 = vadd.f32 %v1441_v34, %v1440_v15  ;;  %v1478_v56 = vsel %vm636_vm4, %v1418_v63, %v1477_v48 }
 0x6fd   :  { %v1386_v17 = vmul.f32 %v1992_v11, %v2747_v35  ;;  %v1431_v20 = vrot.slane %v1430_v14, 1  ;;  %v1425_v22 = vadd.f32 %v1424_v47, %v1423_v36  ;;  %v1836_v47 = vld [vmem:[%s2887_s3 + $0xec] ss:$0 sm:$0xff] }
 0x6fe   :  { %v1437_v57 = vadd.f32 %v1436_v6, %v1435_v12  ;;  %v1443_v37 = vrot.slane %v1442_v41, 2 }
 0x6ff   :  { %v1397_v9 = vmul.f32 %v2749_v51, %v1386_v17  ;;  %v1479_v46 = vsel %vm638_vm5, %v1425_v22, %v1478_v56  ;;  %v1432_v52 = vadd.f32 %v1431_v20, %v1430_v14 }
 0x700   :  { %v1444_v7 = vadd.f32 %v1443_v37, %v1442_v41  ;;  %v1438_v21 = vrot.slane %v1437_v57, 1  ;;  %v1837_v41 = vld [vmem:[%s2887_s3 + $0xed] ss:$0 sm:$0xff] }
 0x701   :  { %v1447_v55 = vsel %vm88_vm2, %v1397_v9, 0.0  ;;  %v1480_v35 = vsel %vm640_vm6, %v1432_v52, %v1479_v46 }
 0x702   :  { %v1448_v8 = vrot.slane %v1447_v55, 4  ;;  %v1445_v43 = vrot.slane %v1444_v7, 1  ;;  %v1439_v31 = vadd.f32 %v1438_v21, %v1437_v57 }
 0x704   :  { %v1449_v30 = vadd.f32 %v1448_v8, %v1447_v55  ;;  %v1481_v51 = vsel %vm642_vm7, %v1439_v31, %v1480_v35  ;;  %v1446_v26 = vadd.f32 %v1445_v43, %v1444_v7 }
 0x706   :  { %v1450_v32 = vrot.slane %v1449_v30, 2  ;;  %v1482_v54 = vsel %vm644_vm8, %v1446_v26, %v1481_v51  ;;  %v1791_v51 = vld [vmem:[%s2887_s3 + $0xe0] sm:$0xff]  ;;  %v1790_v26 = vld [vmem:[%s2887_s3 + $0xd8] sm:$0xff] }
 0x707   :  { %1633 = vmatpush.msra.mxu0 %v1791_v51 }
 0x708   :  { %v1451_v53 = vadd.f32 %v1450_v32, %v1449_v30 }
 0x709   :  { %1634 = vmatpush.msra.mxu0 %v1790_v26 }
 0x70a   :  { %v1452_v10 = vrot.slane %v1451_v53, 1 }
 0x70c   :  { %v1453_v18 = vadd.f32 %v1452_v10, %v1451_v53  ;;  %v1789_v10 = vld [vmem:[%s2887_s3 + $0xd0] sm:$0xff] }
 0x70d   :  { %1635 = vmatpush.msra.mxu0 %v1789_v10 }
 0x70e   :  { %v1483_v19 = vsel %vm646_vm9, %v1453_v18, %v1482_v54  ;;  %v1788_v54 = vld [vmem:[%s2887_s3 + $0xc8] sm:$0xff]  ;;  %v1787_v18 = vld [vmem:[%s2887_s3 + $0xc0] sm:$0xff] }
 0x70f   :  { %1803 = vmatmul.msk.f32.gmra.mxu2 %vm88_vm2, %v1483_v19  ;;  %1636 = vmatpush.msra.mxu0 %v1788_v54  ;;  %v1786_v19 = vld [vmem:[%s2887_s3 + $0xb8] sm:$0xff] }
 0x711   :  { %1637 = vmatpush.msra.mxu0 %v1787_v18 }
 0x713   :  { %1638 = vmatpush.msra.mxu0 %v1786_v19 }
 0x76f   :  { %v1506_v0 = vpop.f32.mrf.mxu2 }
 0x770   :  { %v1507_v27 = vadd.f32 %v1835_v33, %v1506_v0  ;;  %v1784_v0 = vld [vmem:[%s2887_s3 + $0xa8] sm:$0xff] }
 0x772   :  { %v1512_v59 = vadd.f32 %v1507_v27, %v2500_v13  ;;  %v1838_v27 = vld [vmem:[%s2887_s3 + $0xea] ss:$0 sm:$0xff] }
 0x774   :  { %v1514_v25 = vsel %vm88_vm2, %v1512_v59, 0.0 }
 0x775   :  { %1515 = vadd.xlane.f32.xlu0 %v1514_v25 }
 0x792   :  { %v1509_v44 = vpop.f32.mrf.mxu2 }
 0x793   :  { %v1510_v42 = vadd.f32 %v1835_v33, %v1509_v44  ;;  %v1785_v33 = vld [vmem:[%s2887_s3 + $0xb0] sm:$0xff] }
 0x794   :  { %1639 = vmatpush.msra.mxu0 %v1785_v33 }
 0x795   :  { %v1513_v61 = vadd.f32 %v1510_v42, %v2504_v60  ;;  %v1783_v60 = vld [vmem:[%s2887_s3 + $0xa0] sm:$0xff] }
 0x796   :  { %1591 = vmatpush.msrb.mxu3 %v1783_v60  ;;  %1640 = vmatpush.msra.mxu0 %v1784_v0 }
 0x797   :  { %v1517_v23 = vsel %vm88_vm2, %v1513_v61, 0.0 }
 0x798   :  { %1518 = vadd.xlane.f32.xlu2 %v1517_v23  ;;  %1592 = vmatpush.msrb.mxu3 %v1782_v28 }
 0x79a   :  { %1812 = vmatpush.msra.mxu3 %v1791_v51 }
 0x79c   :  { %1813 = vmatpush.msra.mxu3 %v1790_v26  ;;  %v1840_v26 = vld [vmem:[%s2887_s3 + $0xee] ss:$0 sm:$0xff] }
 0x79e   :  { %1814 = vmatpush.msra.mxu3 %v1789_v10 }
 0x7a0   :  { %1815 = vmatpush.msra.mxu3 %v1788_v54  ;;  %v1841_v54 = vld [vmem:[%s2887_s3 + $0xef] ss:$0 sm:$0xff] }
 0x7a2   :  { %1816 = vmatpush.msra.mxu3 %v1787_v18 }
 0x7a4   :  { %1817 = vmatpush.msra.mxu3 %v1786_v19 }
 0x7a6   :  { %1818 = vmatpush.msra.mxu3 %v1785_v33 }
 0x7a8   :  { %1819 = vmatpush.msra.mxu3 %v1784_v0 }
 0x7e8   :  { %v1516_v45 = vpop.xlane.xlu0 %1515 }
 0x7e9   :  { %v1520_v2 = vmul.f32 %v1516_v45, %v2426_v58 }
 0x7eb   :  { %v1522_v3 = vsub.f32 %v1512_v59, %v1520_v2 }
 0x7ed   :  { %v1524_v38 = vmul.f32 %v1522_v3, %v1522_v3  ;;  %v1563_v6 = vmul.f32 %v1836_v47, %v1522_v3 }
 0x7ef   :  { %v1526_v24 = vsel %vm88_vm2, %v1524_v38, 0.0 }
 0x7f0   :  { %1527 = vadd.xlane.f32.xlu1 %v1526_v24 }
 0x80b   :  { %v1519_v4 = vpop.xlane.xlu2 %1518 }
 0x80c   :  { %v1521_v13 = vmul.f32 %v1519_v4, %v2426_v58 }
 0x80e   :  { %v1523_v29 = vsub.f32 %v1513_v61, %v1521_v13 }
 0x810   :  { %v1525_v1 = vmul.f32 %v1523_v29, %v1523_v29  ;;  %v1564_v35 = vmul.f32 %v1836_v47, %v1523_v29 }
 0x812   :  { %v1529_v16 = vsel %vm88_vm2, %v1525_v1, 0.0 }
 0x813   :  { %1530 = vadd.xlane.f32.xlu0 %v1529_v16 }
 0x863   :  { %v1528_v50 = vpop.xlane.xlu1 %1527 }
 0x864   :  { %v1532_v62 = vmul.f32 0.06666667, %v1528_v50 }
 0x866   :  { %1993 = vrsqrt.f32 %v1532_v62  ;;  %vm1541_vm3 = vcmp.eq.f32.partialorder %v1532_v62, inf  ;;  %v1544_v34 = vand.u32 2147483648, %v1532_v62  ;;  %vm1543_vm4 = vcmp.eq.f32.partialorder %v1532_v62, 0.0 }
 0x86c   :  { %v1994_v40 = vpop.eup %1993 }
 0x86d   :  { %v1535_v39 = vmul.f32 %v1994_v40, %v1532_v62 }
 0x86f   :  { %v1536_v5 = vmul.f32 %v1994_v40, %v1535_v39 }
 0x871   :  { %v1537_v36 = vmul.f32 0.5, %v1536_v5  ;;  %v1839_v5 = vld [vmem:[%s2887_s3 + $0xeb] ss:$0 sm:$0xff] }
 0x873   :  { %v1538_v49 = vsub.f32 1.5, %v1537_v36 }
 0x875   :  { %v1539_v15 = vmul.f32 %v1994_v40, %v1538_v49 }
 0x877   :  { %v1540_v12 = vmul.f32 %v1539_v15, %v1532_v62 }
 0x879   :  { %v1542_v63 = vsel %vm1541_vm3, %v1532_v62, %v1540_v12 }
 0x87a   :  { %v1545_v14 = vsel %vm1543_vm4, %v1544_v34, %v1542_v63 }
 0x87b   :  { %v1558_v11 = vadd.f32 1e-06, %v1545_v14 }
 0x87d   :  { %1995 = vrcp.f32 %v1558_v11 }
 0x883   :  { %v1996_v48 = vpop.eup %1995 }
 0x884   :  { %v1565_v17 = vmul.f32 %v1996_v48, %v1563_v6 }
 0x886   :  { %v2810_v57 = vadd.f32 %v1837_v41, %v1565_v17  ;;  %v1531_v37 = vpop.xlane.xlu0 %1530 }
 0x887   :  { %v1533_v9 = vmul.f32 0.06666667, %v1531_v37 }
 0x888   :  { %1804 = vmatmul.msk.f32.vlgmr.msrb.gmra.mxu3 %vm88_vm2, %v2810_v57 }
 0x889   :  { %1997 = vrsqrt.f32 %v1533_v9  ;;  %vm1553_vm5 = vcmp.eq.f32.partialorder %v1533_v9, inf  ;;  %v1556_v46 = vand.u32 2147483648, %v1533_v9  ;;  %vm1555_vm6 = vcmp.eq.f32.partialorder %v1533_v9, 0.0 }
 0x88f   :  { %v1998_v20 = vpop.eup %1997 }
 0x890   :  { %v1547_v56 = vmul.f32 %v1998_v20, %v1533_v9 }
 0x892   :  { %v1548_v22 = vmul.f32 %v1998_v20, %v1547_v56 }
 0x894   :  { %v1549_v7 = vmul.f32 0.5, %v1548_v22  ;;  %v1709_v22 = vld [vmem:[%s2888_s4 + $0x8] sm:$0xff] }
 0x895   :  { %1734 = vmatpush.msra.mxu1 %v1709_v22 }
 0x896   :  { %v1550_v55 = vsub.f32 1.5, %v1549_v7  ;;  %v1708_v7 = vld [vmem:[%s2888_s4] sm:$0xff] }
 0x897   :  { %1735 = vmatpush.msra.mxu1 %v1708_v7 }
 0x898   :  { %v1551_v21 = vmul.f32 %v1998_v20, %v1550_v55 }
 0x89a   :  { %v1552_v8 = vmul.f32 %v1551_v21, %v1533_v9 }
 0x89c   :  { %v1554_v52 = vsel %vm1553_vm5, %v1533_v9, %v1552_v8 }
 0x89d   :  { %v1557_v30 = vsel %vm1555_vm6, %v1556_v46, %v1554_v52 }
 0x89e   :  { %v1559_v43 = vadd.f32 1e-06, %v1557_v30 }
 0x8a0   :  { %1999 = vrcp.f32 %v1559_v43 }
 0x8a6   :  { %v2000_v31 = vpop.eup %1999 }
 0x8a7   :  { %v1566_v32 = vmul.f32 %v2000_v31, %v1564_v35 }
 0x8a9   :  { %v1569_v53 = vadd.f32 %v1837_v41, %v1566_v32 }
 0x8ab   :  { %1805 = vmatmul.msk.f32.gmra.mxu3 %vm88_vm2, %v1569_v53 }
 0x90b   :  { %v1594_v59 = vpop.f32.mrf.mxu3 }
 0x90c   :  { %v1595_v25 = vadd.f32 %v1838_v27, %v1594_v59 }
 0x90e   :  { %v1602_v44 = vmul.f32 0.044715, %v1595_v25  ;;  %v1600_v3 = vmul.f32 0.5, %v1595_v25 }
 0x910   :  { %v1604_v42 = vmul.f32 %v1602_v44, %v1595_v25 }
 0x912   :  { %v1606_v61 = vmul.f32 %v1604_v42, %v1595_v25 }
 0x914   :  { %v1608_v23 = vadd.f32 %v1606_v61, %v1595_v25 }
 0x916   :  { %v1610_v45 = vmul.f32 0.7978846, %v1608_v23 }
 0x918   :  { %2001 = vtanh.f32 %v1610_v45 }
 0x91e   :  { %v2002_v2 = vpop.eup %2001 }
 0x91f   :  { %v1614_v38 = vadd.f32 1.0, %v2002_v2 }
 0x921   :  { %v1616_v24 = vmul.f32 %v1614_v38, %v1600_v3 }
 0x923   :  { %1806 = vmatmul.msk.f32.vlgmr.msra.gmra.mxu0 %vm805_vm15, %v1616_v24 }
 0x92e   :  { %v1597_v4 = vpop.f32.mrf.mxu3 }
 0x92f   :  { %v1598_v13 = vadd.f32 %v1838_v27, %v1597_v4 }
 0x931   :  { %v1603_v29 = vmul.f32 0.044715, %v1598_v13  ;;  %v1601_v62 = vmul.f32 0.5, %v1598_v13 }
 0x933   :  { %v1605_v1 = vmul.f32 %v1603_v29, %v1598_v13 }
 0x935   :  { %v1607_v16 = vmul.f32 %v1605_v1, %v1598_v13 }
 0x937   :  { %v1609_v60 = vadd.f32 %v1607_v16, %v1598_v13  ;;  %v1842_v16 = vld [vmem:[%s2889_s5] ss:$0 sm:$0xff] }
 0x939   :  { %v1611_v28 = vmul.f32 0.7978846, %v1609_v60 }
 0x93b   :  { %2003 = vtanh.f32 %v1611_v28 }
 0x941   :  { %v2004_v50 = vpop.eup %2003 }
 0x942   :  { %v1615_v40 = vadd.f32 1.0, %v2004_v50 }
 0x944   :  { %v1617_v39 = vmul.f32 %v1615_v40, %v1601_v62 }
 0x946   :  { %1807 = vmatmul.msk.f32.vlgmr.msra.gmra.mxu3 %vm805_vm15, %v1617_v39 }
 0x9a0   :  { %v1642_v36 = vpop.f32.mrf.mxu0 }
 0x9a1   :  { %v1643_v49 = vadd.f32 %v1839_v5, %v1642_v36 }
 0x9a3   :  { %v1648_v15 = vadd.f32 %v1643_v49, %v2810_v57 }
 0x9a5   :  { %v1650_v12 = vsel %vm88_vm2, %v1648_v15, 0.0 }
 0x9a6   :  { %1651 = vadd.xlane.f32.xlu2 %v1650_v12 }
 0x9c9   :  { %v1645_v34 = vpop.f32.mrf.mxu3 }
 0x9ca   :  { %v1646_v63 = vadd.f32 %v1839_v5, %v1645_v34 }
 0x9cc   :  { %v1649_v14 = vadd.f32 %v1646_v63, %v1569_v53 }
 0x9ce   :  { %v1653_v11 = vsel %vm88_vm2, %v1649_v14, 0.0 }
 0x9cf   :  { %1654 = vadd.xlane.f32.xlu1 %v1653_v11 }
 0xa19   :  { %v1652_v47 = vpop.xlane.xlu2 %1651 }
 0xa1a   :  { %v1656_v6 = vmul.f32 %v1652_v47, %v2426_v58 }
 0xa1c   :  { %v1658_v41 = vsub.f32 %v1648_v15, %v1656_v6 }
 0xa1e   :  { %v1660_v48 = vmul.f32 %v1658_v41, %v1658_v41  ;;  %v1699_v10 = vmul.f32 %v1840_v26, %v1658_v41 }
 0xa20   :  { %v1662_v17 = vsel %vm88_vm2, %v1660_v48, 0.0 }
 0xa21   :  { %1663 = vadd.xlane.f32.xlu0 %v1662_v17 }
 0xa42   :  { %v1655_v37 = vpop.xlane.xlu1 %1654 }
 0xa43   :  { %v1657_v57 = vmul.f32 %v1655_v37, %v2426_v58 }
 0xa45   :  { %v1659_v9 = vsub.f32 %v1649_v14, %v1657_v57 }
 0xa47   :  { %v1661_v20 = vmul.f32 %v1659_v9, %v1659_v9  ;;  %v1700_v4 = vmul.f32 %v1840_v26, %v1659_v9 }
 0xa49   :  { %v1665_v56 = vsel %vm88_vm2, %v1661_v20, 0.0 }
 0xa4a   :  { %1666 = vadd.xlane.f32.xlu2 %v1665_v56 }
 0xa94   :  { %v1664_v55 = vpop.xlane.xlu0 %1663 }
 0xa95   :  { %v1668_v21 = vmul.f32 0.06666667, %v1664_v55 }
 0xa97   :  { %2005 = vrsqrt.f32 %v1668_v21  ;;  %vm1677_vm7 = vcmp.eq.f32.partialorder %v1668_v21, inf  ;;  %v1680_v31 = vand.u32 2147483648, %v1668_v21  ;;  %vm1679_vm8 = vcmp.eq.f32.partialorder %v1668_v21, 0.0 }
 0xa9d   :  { %v2006_v8 = vpop.eup %2005 }
 0xa9e   :  { %v1671_v58 = vmul.f32 %v2006_v8, %v1668_v21 }
 0xaa0   :  { %v1672_v46 = vmul.f32 %v2006_v8, %v1671_v58 }
 0xaa2   :  { %v1673_v52 = vmul.f32 0.5, %v1672_v46 }
 0xaa4   :  { %v1674_v30 = vsub.f32 1.5, %v1673_v52 }
 0xaa6   :  { %v1675_v43 = vmul.f32 %v2006_v8, %v1674_v30 }
 0xaa8   :  { %v1676_v35 = vmul.f32 %v1675_v43, %v1668_v21 }
 0xaaa   :  { %v1678_v32 = vsel %vm1677_vm7, %v1668_v21, %v1676_v35 }
 0xaab   :  { %v1681_v53 = vsel %vm1679_vm8, %v1680_v31, %v1678_v32 }
 0xaac   :  { %v1694_v51 = vadd.f32 1e-06, %v1681_v53 }
 0xaae   :  { %2007 = vrcp.f32 %v1694_v51 }
 0xab4   :  { %v2008_v18 = vpop.eup %2007 }
 0xab5   :  { %v1701_v19 = vmul.f32 %v2008_v18, %v1699_v10 }
 0xab7   :  { %v1704_v33 = vadd.f32 %v1841_v54, %v1701_v19 }
 0xab9   :  { %1808 = vmatmul.msk.f32.vlgmr.msra.gmra.mxu1 %vm88_vm2, %v1704_v33  ;;  %1706 = vst.msk [vmem:[#allocation2] sm:$0xff] %vm88_vm2, %v1704_v33 }
 0xabd   :  { %v1667_v0 = vpop.xlane.xlu2 %1666 }
 0xabe   :  { %v1669_v27 = vmul.f32 0.06666667, %v1667_v0 }
 0xac0   :  { %2009 = vrsqrt.f32 %v1669_v27  ;;  %vm1689_vm9 = vcmp.eq.f32.partialorder %v1669_v27, inf  ;;  %v1692_v2 = vand.u32 2147483648, %v1669_v27  ;;  %vm1691_vm13 = vcmp.eq.f32.partialorder %v1669_v27, 0.0 }
 0xac6   :  { %v2010_v59 = vpop.eup %2009 }
 0xac7   :  { %v1683_v25 = vmul.f32 %v2010_v59, %v1669_v27 }
 0xac9   :  { %v1684_v44 = vmul.f32 %v2010_v59, %v1683_v25 }
 0xacb   :  { %v1685_v42 = vmul.f32 0.5, %v1684_v44 }
 0xacd   :  { %v1686_v61 = vsub.f32 1.5, %v1685_v42 }
 0xacf   :  { %v1687_v23 = vmul.f32 %v2010_v59, %v1686_v61 }
 0xad1   :  { %v1688_v45 = vmul.f32 %v1687_v23, %v1669_v27 }
 0xad3   :  { %v1690_v3 = vsel %vm1689_vm9, %v1669_v27, %v1688_v45 }
 0xad4   :  { %v1693_v38 = vsel %vm1691_vm13, %v1692_v2, %v1690_v3 }
 0xad5   :  { %v1695_v24 = vadd.f32 1e-06, %v1693_v38 }
 0xad7   :  { %2011 = vrcp.f32 %v1695_v24 }
 0xadd   :  { %v2012_v13 = vpop.eup %2011 }
 0xade   :  { %v1702_v29 = vmul.f32 %v2012_v13, %v1700_v4 }
 0xae0   :  { %v1705_v1 = vadd.f32 %v1841_v54, %v1702_v29 }
 0xae2   :  { %1707 = vst.msk [vmem:[#allocation2 + $0x8] sm:$0xff] %vm88_vm2, %v1705_v1  ;;  %1809 = vmatmul.msk.f32.gmra.mxu1 %vm88_vm2, %v1705_v1 }
 0xae3   :  { %1759 = dma.vmem_to_hbm [thread:$0]  %s1752_s28, 256, %s1754_s26, [#allocation3], %s2043_s29, %s2043_s29, %s2044_s30  }
 0xb36   :  { %v1737_v60 = vpop.f32.mrf.mxu1 }
 0xb37   :  { %v1738_v28 = vadd.f32 %v1842_v16, %v1737_v60 }
 0xb39   :  { %1743 = vst.msk [vmem:[%s2890_s6] sm:$0xff] %vm31_vm1, %v1738_v28 }
 0xb5f   :  { %v1740_v50 = vpop.f32.mrf.mxu1 }
 0xb60   :  { %v1741_v62 = vadd.f32 %v1842_v16, %v1740_v50 }
 0xb62   :  { %1744 = vst.msk [vmem:[%s2890_s6 + $0x8] sm:$0xff] %vm31_vm1, %v1741_v62 }
 0xb63   :  { %2037 = dma.done.wait [#allocation3], 256  }
 0xb64   :  { %2038 = vsyncadd [#allocation3], 4294967040 }
 0xb65   :  { %1766 = vsyncpa [#allocation3], 1 }

</bundles_post_ra>
